<compile_context>
chip_gen: v7x
topology: tpu7x:2x2x1
jax: 0.10.0
libtpu: 0.0.40
codegen_flags: <defaults>
</compile_context>

<pallas_src>
import functools

import numpy as np

import jax
import jax.numpy as jnp
from jax import lax
from jax.experimental import pallas as pl
from jax.experimental.pallas import tpu as pltpu


def _device_kind():
    try:
        return jax.devices()[0].device_kind.lower()
    except Exception:
        return ""


# ---------------------------------------------------------------------------
# Fused, time-chunked RK4 solver kernel
# ---------------------------------------------------------------------------
def _rk4_mlp_solver_kernel(ts_ref, sign_ref, y0_ref, w1_ref, b1_ref, w2_ref,
                           b2_ref, w3_ref, b3_ref, out_ref, y_state, *,
                           time_chunk, act_dtype):
    """One grid step = `time_chunk` consecutive RK4 steps for one batch tile.

    grid = (batch_tiles_total, ceil(T/K)).  The ODE state lives in a VMEM
    scratch across the (inner) time axis; the MLP weights have constant
    index_maps so they stay VMEM-resident; ts and the per-tile sign are in
    SMEM via scalar prefetch.
    """
    b = pl.program_id(0)
    t = pl.program_id(1)
    wdt = w1_ref.dtype          # matmul input dtype (f32 or bf16); acc is f32.
    sgn = sign_ref[b]           # +1 forward, -1 reverse (trsode branch).

    def grad_net(y):
        h = jnp.dot(y.astype(wdt), w1_ref[...],
                    preferred_element_type=jnp.float32) + b1_ref[...]
        h = jnp.tanh(h.astype(act_dtype))
        h = jnp.dot(h.astype(wdt), w2_ref[...],
                    preferred_element_type=jnp.float32) + b2_ref[...]
        h = jnp.tanh(h.astype(act_dtype))
        return jnp.dot(h.astype(wdt), w3_ref[...],
                       preferred_element_type=jnp.float32) + b3_ref[...]

    @pl.when(t == 0)
    def _():
        y_state[...] = y0_ref[...].astype(jnp.float32)

    def step(j, carry):
        g_idx = t * time_chunk + j
        prev = jnp.maximum(g_idx - 1, 0)
        # RK4 of (sign*f) with step dt  ==  RK4 of f with step (sign*dt).
        # At g_idx == 0 (and for padded trailing steps) dt == 0, so the state
        # is reproduced exactly (output row 0 == initial condition, bitwise).
        dt = sgn * (ts_ref[g_idx] - ts_ref[prev])
        half_dt = 0.5 * dt
        dt_6 = dt * (1.0 / 6.0)
        dt_3 = dt * (1.0 / 3.0)

        y = y_state[...]
        # Incremental accumulator: only (y, y_acc, current k) live at a time.
        k = grad_net(y)                       # k1
        y_acc = y + dt_6 * k
        k = grad_net(y + half_dt * k)         # k2
        y_acc = y_acc + dt_3 * k
        k = grad_net(y + half_dt * k)         # k3
        y_acc = y_acc + dt_3 * k
        k = grad_net(y + dt * k)              # k4
        y_new = y_acc + dt_6 * k

        y_state[...] = y_new
        out_ref[j, :, :] = y_new.astype(out_ref.dtype)
        return carry

    lax.fori_loop(0, time_chunk, step, 0)


def rk4_solve(first_point, time_steps, params, *, signs=(1.0,),
              matmul_dtype=jnp.float32, out_dtype=jnp.float32,
              time_chunk=8, tm=None, elementwise_bf16=None,
              single_buffer_weights=False):
    """Fixed-step RK4 of sign*f for each sign in `signs` (one fused pallas_call).

    first_point: (B, D) shared initial state, time_steps: (T,).
    Returns a tuple of (T, B, D) trajectories, one per sign (index 0 = y0).
    """
    B, D = first_point.shape
    T = int(time_steps.shape[0])
    U = params["w1"].shape[1]
    n_prob = len(signs)

    kind = _device_kind()
    num_tc = 2 if "v7" in kind else 1    # v7x has 2 TensorCores per chip.

    # Lane-dense padding of feature / hidden dims (exact: zero pad + tanh(0)=0).
    D_pad = 128 * pl.cdiv(D, 128)
    U_pad = 128 * pl.cdiv(U, 128)

    # --- generation-aware batch tiling (perf review) -------------------------
    if tm is None:
        # One tile per problem on 1-TC chips; enough total tiles to feed both
        # TensorCores on v7x (the fused fwd/rev solves already give 2 tiles).
        want_tiles_per_prob = max(1, num_tc // n_prob)
        tm = 8 * pl.cdiv(pl.cdiv(B, want_tiles_per_prob), 8)
        cap = 512
        if U_pad > 512 or "v5" in kind:   # v5e default scoped VMEM is 16 MiB.
            cap = 256
        tm = min(tm, cap)
    tm = max(8, 8 * pl.cdiv(tm, 8))
    n_bt = pl.cdiv(B, tm)                 # batch tiles per problem
    B_pad = n_bt * tm
    n_tiles = n_prob * n_bt

    # --- time chunking --------------------------------------------------------
    K = max(1, min(int(time_chunk), T))
    n_tchunks = pl.cdiv(T, K)
    T_pad = n_tchunks * K

    # --- elementwise (tanh) dtype --------------------------------------------
    mm_is_bf16 = np.dtype(matmul_dtype) == np.dtype(jnp.bfloat16)
    if elementwise_bf16 is None:
        # bf16 VPU/EUP exists on v6e / v7x, not on v5e (or older).
        elementwise_bf16 = mm_is_bf16 and ("v6" in kind or "v7" in kind)
    act_dtype = jnp.bfloat16 if elementwise_bf16 else jnp.float32

    f32 = jnp.float32
    y0_pad = jnp.zeros((B_pad, D_pad), f32).at[:B, :D].set(
        first_point.astype(f32))
    # TODO(synk): zero-padded batch rows still integrate MLP(0) (wasted but
    # exact compute); not worth masking at these padding amounts.
    y0_all = jnp.concatenate([y0_pad] * n_prob, axis=0) if n_prob > 1 else y0_pad

    w1 = jnp.zeros((D_pad, U_pad), matmul_dtype).at[:D, :U].set(
        params["w1"].astype(matmul_dtype))
    b1 = jnp.zeros((1, U_pad), f32).at[:, :U].set(params["b1"].astype(f32))
    w2 = jnp.zeros((U_pad, U_pad), matmul_dtype).at[:U, :U].set(
        params["w2"].astype(matmul_dtype))
    b2 = jnp.zeros((1, U_pad), f32).at[:, :U].set(params["b2"].astype(f32))
    w3 = jnp.zeros((U_pad, D_pad), matmul_dtype).at[:U, :D].set(
        params["w3"].astype(matmul_dtype))
    b3 = jnp.zeros((1, D_pad), f32).at[:, :D].set(params["b3"].astype(f32))

    ts = time_steps.astype(f32)
    if T_pad > T:
        # Pad ts with its last value -> dt == 0 on padded steps (state frozen).
        ts = jnp.concatenate([ts, jnp.full((T_pad - T,), ts[T - 1], f32)])

    signs_per_tile = jnp.asarray(
        np.repeat(np.asarray(signs, dtype=np.float32), n_bt))

    def wspec(shape):
        # Constant index_map -> weights stay VMEM-resident across the grid.
        if single_buffer_weights:
            # Optional (v7x / large n_units): avoid reserving 2x VMEM for the
            # never-re-DMA'd constant weights.
            return pl.BlockSpec(shape, lambda b, t, ts, sg: (0, 0),
                                pipeline_mode=pl.Buffered(1))
        return pl.BlockSpec(shape, lambda b, t, ts, sg: (0, 0))

    grid_spec = pltpu.PrefetchScalarGridSpec(
        num_scalar_prefetch=2,            # time grid + per-tile sign -> SMEM
        grid=(n_tiles, n_tchunks),
        in_specs=[
            pl.BlockSpec((tm, D_pad), lambda b, t, ts, sg: (b, 0)),   # y0 tile
            wspec((D_pad, U_pad)),                                    # w1
            wspec((1, U_pad)),                                        # b1
            wspec((U_pad, U_pad)),                                    # w2
            wspec((1, U_pad)),                                        # b2
            wspec((U_pad, D_pad)),                                    # w3
            wspec((1, D_pad)),                                        # b3
        ],
        out_specs=pl.BlockSpec((K, tm, D_pad), lambda b, t, ts, sg: (t, b, 0)),
        scratch_shapes=[pltpu.VMEM((tm, D_pad), jnp.float32)],        # ODE state
    )

    # VMEM estimate; only raise the scoped limit when it is actually needed
    # (large n_units / tm), never on the common small configurations.
    wbytes = np.dtype(matmul_dtype).itemsize
    obytes = np.dtype(out_dtype).itemsize
    est = (2 * ((D_pad * U_pad + U_pad * U_pad + U_pad * D_pad) * wbytes
                + (2 * U_pad + D_pad) * 4
                + K * tm * D_pad * obytes
                + tm * D_pad * 4)
           + tm * D_pad * 4
           + 6 * tm * max(D_pad, U_pad) * 4)
    vmem_limit = None
    if est > (30 << 20):
        vmem_limit = int(min(est + (8 << 20), 64 << 20))

    kernel = functools.partial(_rk4_mlp_solver_kernel,
                               time_chunk=K, act_dtype=act_dtype)

    out = pl.pallas_call(
        kernel,
        out_shape=jax.ShapeDtypeStruct((T_pad, n_prob * B_pad, D_pad),
                                       out_dtype),
        grid_spec=grid_spec,
        compiler_params=pltpu.CompilerParams(
            dimension_semantics=("parallel", "arbitrary"),
            vmem_limit_bytes=vmem_limit),
    )(ts, signs_per_tile, y0_all, w1, b1, w2, b2, w3, b3)

    return tuple(out[:T, p * B_pad:p * B_pad + B, :D] for p in range(n_prob))


# ---------------------------------------------------------------------------
# DiffeqSolver.forward wrapper (output formatting matches the PyTorch module)
# ---------------------------------------------------------------------------
def _format_pred(pred_flat, n_traj_samples, n_traj, feat_aug, augment_dim):
    t = pred_flat.shape[0]
    py = pred_flat.reshape(t, -1, feat_aug)          # (T, ns*n_traj, feat)
    py = jnp.transpose(py, (1, 0, 2))                # (ns*n_traj, T, feat)
    py = py.reshape(n_traj_samples, n_traj, t, feat_aug)
    if augment_dim > 0:
        py = py[..., :-augment_dim]
    return py


def diffeq_solver_forward(first_point, time_steps_to_predict, params, *,
                          num_atoms, augment_dim=0, use_trsode=True,
                          matmul_dtype=jnp.float32, time_is_padded=None,
                          **solver_kwargs):
    """Pallas-backed DiffeqSolver.forward.

    first_point: (n_traj_samples, n_traj, feature) with n_traj = b * num_atoms.
    Returns (pred_y, pred_y_reverse), each (n_traj_samples, n_traj, T, feature).
    """
    n_traj_samples, n_traj, feature = first_point.shape
    assert n_traj % num_atoms == 0

    ts = jnp.asarray(time_steps_to_predict, jnp.float32)
    # TODO(synk): if time_steps is a traced array, pass time_is_padded
    # explicitly (static) — the data-dependent check below needs concrete data.
    if time_is_padded is None:
        time_is_padded = bool(np.asarray(ts)[0] != 0.0)
    if time_is_padded:
        ts = jnp.concatenate([jnp.zeros((1,), jnp.float32), ts])

    fp = first_point.reshape(-1, num_atoms, feature)
    if augment_dim > 0:
        aug = jnp.zeros(fp.shape[:2] + (augment_dim,), fp.dtype)
        fp = jnp.concatenate([fp, aug], axis=2)
    feat_aug = feature + augment_dim
    y0_flat = fp.reshape(-1, feat_aug)

    if use_trsode:
        # trsode branch: forward (f) and reverse (-f) from the SAME initial
        # state, fused into one pallas_call (per-tile sign via scalar prefetch).
        pred_y_flat, pred_y_rev_flat = rk4_solve(
            y0_flat, ts, params, signs=(1.0, -1.0),
            matmul_dtype=matmul_dtype, **solver_kwargs)
    else:
        # TODO(synk): original non-trsode path uses an adaptive odeint of
        # reverse_ode_func from pred_y[-1]; approximated with fixed-step RK4.
        ts_reverse = jnp.flip(ts.max() - ts)
        (pred_y_flat,) = rk4_solve(y0_flat, ts, params, signs=(1.0,),
                                   matmul_dtype=matmul_dtype, **solver_kwargs)
        (rev_flipped,) = rk4_solve(pred_y_flat[-1], ts_reverse, params,
                                   signs=(-1.0,), matmul_dtype=matmul_dtype,
                                   **solver_kwargs)
        pred_y_rev_flat = jnp.flip(rev_flipped, axis=0)

    if time_is_padded:
        pred_y_flat = pred_y_flat[1:]
        pred_y_rev_flat = pred_y_rev_flat[1:]

    pred_y = _format_pred(pred_y_flat, n_traj_samples, n_traj, feat_aug,
                          augment_dim)
    pred_y_reverse = _format_pred(pred_y_rev_flat, n_traj_samples, n_traj,
                                  feat_aug, augment_dim)
    return pred_y, pred_y_reverse


def init_params(key, latent_dim, n_units):
    """Mimics utils.init_network_weights: W ~ N(0, 0.1), b = 0."""
    k1, k2, k3 = jax.random.split(key, 3)
    std = 0.1
    return {
        "w1": std * jax.random.normal(k1, (latent_dim, n_units), jnp.float32),
        "b1": jnp.zeros((1, n_units), jnp.float32),
        "w2": std * jax.random.normal(k2, (n_units, n_units), jnp.float32),
        "b2": jnp.zeros((1, n_units), jnp.float32),
        "w3": std * jax.random.normal(k3, (n_units, latent_dim), jnp.float32),
        "b3": jnp.zeros((1, latent_dim), jnp.float32),
    }


# ---------------------------------------------------------------------------
# Pure-JAX reference (for correctness checking)
# ---------------------------------------------------------------------------
def _mlp_ref(y, params):
    h = jnp.tanh(y @ params["w1"] + params["b1"])
    h = jnp.tanh(h @ params["w2"] + params["b2"])
    return h @ params["w3"] + params["b3"]


def _rk4_solve_ref(y0, ts, params, backwards=False):
    sign = -1.0 if backwards else 1.0
    f = lambda y: sign * _mlp_ref(y, params)
    ys = [y0]
    y = y0
    for i in range(1, int(ts.shape[0])):
        dt = ts[i] - ts[i - 1]
        k1 = f(y)
        k2 = f(y + 0.5 * dt * k1)
        k3 = f(y + 0.5 * dt * k2)
        k4 = f(y + dt * k3)
        y = y + (dt / 6.0) * (k1 + 2.0 * k2 + 2.0 * k3 + k4)
        ys.append(y)
    return jnp.stack(ys, axis=0)


if __name__ == "__main__":
    key = jax.random.PRNGKey(0)
    k_fp, k_p = jax.random.split(key)

    n_traj_samples, n_balls, n_obs = 2, 4, 8      # n_traj = n_obs * n_balls
    feature, n_units, augment_dim = 16, 64, 0
    n_traj = n_obs * n_balls
    T = 8

    first_point = jax.random.normal(
        k_fp, (n_traj_samples, n_traj, feature), jnp.float32)
    time_steps = jnp.linspace(0.0, 1.0, T).astype(jnp.float32)
    params = init_params(k_p, feature + augment_dim, n_units)

    # --- trsode path (fused forward + reverse solve in one pallas_call) ------
    pred_y, pred_y_rev = diffeq_solver_forward(
        first_point, time_steps, params,
        num_atoms=n_balls, augment_dim=augment_dim, use_trsode=True)
    pred_y, pred_y_rev = jax.block_until_ready((pred_y, pred_y_rev))

    y0_flat = first_point.reshape(-1, feature)
    ref_fwd = _format_pred(_rk4_solve_ref(y0_flat, time_steps, params, False),
                           n_traj_samples, n_traj, feature, 0)
    ref_rev = _format_pred(_rk4_solve_ref(y0_flat, time_steps, params, True),
                           n_traj_samples, n_traj, feature, 0)

    assert pred_y.shape == (n_traj_samples, n_traj, T, feature)
    assert pred_y_rev.shape == (n_traj_samples, n_traj, T, feature)
    # trsode invariant from the spec: both trajectories share the initial state.
    assert bool(jnp.all(pred_y_rev[:, :, 0, :] == pred_y[:, :, 0, :]))
    assert jnp.allclose(pred_y, ref_fwd, atol=1e-3, rtol=1e-3)
    assert jnp.allclose(pred_y_rev, ref_rev, atol=1e-3, rtol=1e-3)

    # --- padded time grid + multi-chunk time axis (T=12 > K=8) ---------------
    T2 = 12
    time_steps2 = jnp.linspace(0.1, 1.0, T2).astype(jnp.float32)
    pred_y2, pred_y2_rev = diffeq_solver_forward(
        first_point, time_steps2, params,
        num_atoms=n_balls, augment_dim=augment_dim, use_trsode=True)
    pred_y2, pred_y2_rev = jax.block_until_ready((pred_y2, pred_y2_rev))

    ts2_full = jnp.concatenate([jnp.zeros((1,), jnp.float32), time_steps2])
    ref2_fwd = _format_pred(
        _rk4_solve_ref(y0_flat, ts2_full, params, False)[1:],
        n_traj_samples, n_traj, feature, 0)
    ref2_rev = _format_pred(
        _rk4_solve_ref(y0_flat, ts2_full, params, True)[1:],
        n_traj_samples, n_traj, feature, 0)
    assert pred_y2.shape == (n_traj_samples, n_traj, T2, feature)
    assert jnp.allclose(pred_y2, ref2_fwd, atol=1e-3, rtol=1e-3)
    assert jnp.allclose(pred_y2_rev, ref2_rev, atol=1e-3, rtol=1e-3)

    # --- bf16 matmul-input fast path (f32 accumulation + f32 state) ----------
    pred_y_bf16, _ = diffeq_solver_forward(
        first_point, time_steps, params,
        num_atoms=n_balls, augment_dim=augment_dim, use_trsode=True,
        matmul_dtype=jnp.bfloat16)
    pred_y_bf16 = jax.block_until_ready(pred_y_bf16)
    assert bool(jnp.all(jnp.isfinite(pred_y_bf16)))
    assert jnp.allclose(pred_y_bf16, ref_fwd, atol=1e-1, rtol=1e-1)

    print("KERNEL_OK")
</pallas_src>

<mosaic_0001>
module attributes {stable_mosaic.version = 11 : i64} {
  func.func @_rk4_mlp_solver_kernel(%arg0: i32, %arg1: i32, %arg2: memref<8xf32, #tpu.memory_space<smem>>, %arg3: memref<2xf32, #tpu.memory_space<smem>>, %arg4: memref<64x128xf32, #tpu.memory_space<vmem>>, %arg5: memref<128x128xf32, #tpu.memory_space<vmem>>, %arg6: memref<1x128xf32, #tpu.memory_space<vmem>>, %arg7: memref<128x128xf32, #tpu.memory_space<vmem>>, %arg8: memref<1x128xf32, #tpu.memory_space<vmem>>, %arg9: memref<128x128xf32, #tpu.memory_space<vmem>>, %arg10: memref<1x128xf32, #tpu.memory_space<vmem>>, %arg11: memref<8x64x128xf32, #tpu.memory_space<vmem>>, %arg12: memref<64x128xf32, #tpu.memory_space<vmem>>) attributes {dimension_semantics = [#tpu.dimension_semantics<parallel>, #tpu.dimension_semantics<arbitrary>], iteration_bounds = array<i64: 2, 1>, scalar_prefetch = 2 : i64, scratch_operands = 1 : i64, tpu.core_type = #tpu.core_type<tc>, window_params = [{transform_indices = @transform_0, window_bounds = array<i64: 64, 128>}, {pipeline_mode = #tpu.pipeline_mode<synchronous>, transform_indices = @transform_1, window_bounds = array<i64: 128, 128>}, {pipeline_mode = #tpu.pipeline_mode<synchronous>, transform_indices = @transform_2, window_bounds = array<i64: 1, 128>}, {pipeline_mode = #tpu.pipeline_mode<synchronous>, transform_indices = @transform_3, window_bounds = array<i64: 128, 128>}, {pipeline_mode = #tpu.pipeline_mode<synchronous>, transform_indices = @transform_4, window_bounds = array<i64: 1, 128>}, {pipeline_mode = #tpu.pipeline_mode<synchronous>, transform_indices = @transform_5, window_bounds = array<i64: 128, 128>}, {pipeline_mode = #tpu.pipeline_mode<synchronous>, transform_indices = @transform_6, window_bounds = array<i64: 1, 128>}, {transform_indices = @transform_7, window_bounds = array<i64: 8, 64, 128>}]} {
    %0 = arith.index_cast %arg0 : i32 to index
    %1 = memref.load %arg3[%0] : memref<2xf32, #tpu.memory_space<smem>>
    %c0_i32 = arith.constant 0 : i32
    %2 = arith.cmpi eq, %arg1, %c0_i32 : i32
    %3 = arith.extui %2 : i1 to i32
    %c0_i32_0 = arith.constant 0 : i32
    %4 = arith.cmpi ne, %3, %c0_i32_0 : i32
    scf.if %4 {
      %c0 = arith.constant 0 : index
      %c0_3 = arith.constant 0 : index
      %6 = vector.load %arg4[%c0, %c0_3] : memref<64x128xf32, #tpu.memory_space<vmem>>, vector<64x128xf32>
      %c0_4 = arith.constant 0 : index
      %c0_5 = arith.constant 0 : index
      %7 = vector.load %arg12[%c0_4, %c0_5] : memref<64x128xf32, #tpu.memory_space<vmem>>, vector<64x128xf32>
      tpu.vector_store %arg12[%c0_4, %c0_5], %6 {strides = array<i32>} : memref<64x128xf32, #tpu.memory_space<vmem>>, vector<64x128xf32>,
    } else {
    }
    %c0_i32_1 = arith.constant 0 : i32
    %c8_i32 = arith.constant 8 : i32
    %5 = arith.addi %c0_i32_1, %c8_i32 : i32
    %c1_i32 = arith.constant 1 : i32
    scf.for %arg13 = %c0_i32_1 to %5 step %c1_i32  : i32 {
      %c8_i32_3 = arith.constant 8 : i32
      %6 = arith.muli %arg1, %c8_i32_3 : i32
      %7 = arith.addi %6, %arg13 : i32
      %c1_i32_4 = arith.constant 1 : i32
      %8 = arith.subi %7, %c1_i32_4 : i32
      %c0_i32_5 = arith.constant 0 : i32
      %9 = arith.maxsi %8, %c0_i32_5 : i32
      %10 = arith.index_cast %7 : i32 to index
      %11 = memref.load %arg2[%10] : memref<8xf32, #tpu.memory_space<smem>>
      %12 = arith.index_cast %9 : i32 to index
      %13 = memref.load %arg2[%12] : memref<8xf32, #tpu.memory_space<smem>>
      %14 = arith.subf %11, %13 : f32
      %15 = arith.mulf %1, %14 : f32
      %cst = arith.constant 5.000000e-01 : f32
      %16 = arith.mulf %cst, %15 : f32
      %cst_6 = arith.constant 0.166666672 : f32
      %17 = arith.mulf %15, %cst_6 : f32
      %cst_7 = arith.constant 0.333333343 : f32
      %18 = arith.mulf %15, %cst_7 : f32
      %c0 = arith.constant 0 : index
      %c0_8 = arith.constant 0 : index
      %19 = vector.load %arg12[%c0, %c0_8] : memref<64x128xf32, #tpu.memory_space<vmem>>, vector<64x128xf32>
      %c0_9 = arith.constant 0 : index
      %c0_10 = arith.constant 0 : index
      %20 = vector.load %arg5[%c0_9, %c0_10] : memref<128x128xf32, #tpu.memory_space<vmem>>, vector<128x128xf32>
      %cst_11 = arith.constant dense<0.000000e+00> : vector<64x128xf32>
      %21 = tpu.matmul %19, %20, %cst_11 {dimension_numbers = #tpu.dot_dimension_numbers<[1], [0], [0], [1], [0, 0, 1, 1], [], []>} : vector<64x128xf32>, vector<128x128xf32>, vector<64x128xf32> -> vector<64x128xf32>
      %c0_12 = arith.constant 0 : index
      %c0_13 = arith.constant 0 : index
      %22 = vector.load %arg6[%c0_12, %c0_13] : memref<1x128xf32, #tpu.memory_space<vmem>>, vector<1x128xf32>
      %23 = vector.broadcast %22 : vector<1x128xf32> to vector<64x128xf32>
      %24 = arith.addf %21, %23 : vector<64x128xf32>
      %25 = math.tanh %24 : vector<64x128xf32>
      %c0_14 = arith.constant 0 : index
      %c0_15 = arith.constant 0 : index
      %26 = vector.load %arg7[%c0_14, %c0_15] : memref<128x128xf32, #tpu.memory_space<vmem>>, vector<128x128xf32>
      %cst_16 = arith.constant dense<0.000000e+00> : vector<64x128xf32>
      %27 = tpu.matmul %25, %26, %cst_16 {dimension_numbers = #tpu.dot_dimension_numbers<[1], [0], [0], [1], [0, 0, 1, 1], [], []>} : vector<64x128xf32>, vector<128x128xf32>, vector<64x128xf32> -> vector<64x128xf32>
      %c0_17 = arith.constant 0 : index
      %c0_18 = arith.constant 0 : index
      %28 = vector.load %arg8[%c0_17, %c0_18] : memref<1x128xf32, #tpu.memory_space<vmem>>, vector<1x128xf32>
      %29 = vector.broadcast %28 : vector<1x128xf32> to vector<64x128xf32>
      %30 = arith.addf %27, %29 : vector<64x128xf32>
      %31 = math.tanh %30 : vector<64x128xf32>
      %c0_19 = arith.constant 0 : index
      %c0_20 = arith.constant 0 : index
      %32 = vector.load %arg9[%c0_19, %c0_20] : memref<128x128xf32, #tpu.memory_space<vmem>>, vector<128x128xf32>
      %cst_21 = arith.constant dense<0.000000e+00> : vector<64x128xf32>
      %33 = tpu.matmul %31, %32, %cst_21 {dimension_numbers = #tpu.dot_dimension_numbers<[1], [0], [0], [1], [0, 0, 1, 1], [], []>} : vector<64x128xf32>, vector<128x128xf32>, vector<64x128xf32> -> vector<64x128xf32>
      %c0_22 = arith.constant 0 : index
      %c0_23 = arith.constant 0 : index
      %34 = vector.load %arg10[%c0_22, %c0_23] : memref<1x128xf32, #tpu.memory_space<vmem>>, vector<1x128xf32>
      %35 = vector.broadcast %34 : vector<1x128xf32> to vector<64x128xf32>
      %36 = arith.addf %33, %35 : vector<64x128xf32>
      %37 = vector.broadcast %17 : f32 to vector<64x128xf32>
      %38 = arith.mulf %37, %36 : vector<64x128xf32>
      %39 = arith.addf %19, %38 : vector<64x128xf32>
      %40 = vector.broadcast %16 : f32 to vector<64x128xf32>
      %41 = arith.mulf %40, %36 : vector<64x128xf32>
      %42 = arith.addf %19, %41 : vector<64x128xf32>
      %c0_24 = arith.constant 0 : index
      %c0_25 = arith.constant 0 : index
      %43 = vector.load %arg5[%c0_24, %c0_25] : memref<128x128xf32, #tpu.memory_space<vmem>>, vector<128x128xf32>
      %cst_26 = arith.constant dense<0.000000e+00> : vector<64x128xf32>
      %44 = tpu.matmul %42, %43, %cst_26 {dimension_numbers = #tpu.dot_dimension_numbers<[1], [0], [0], [1], [0, 0, 1, 1], [], []>} : vector<64x128xf32>, vector<128x128xf32>, vector<64x128xf32> -> vector<64x128xf32>
      %c0_27 = arith.constant 0 : index
      %c0_28 = arith.constant 0 : index
      %45 = vector.load %arg6[%c0_27, %c0_28] : memref<1x128xf32, #tpu.memory_space<vmem>>, vector<1x128xf32>
      %46 = vector.broadcast %45 : vector<1x128xf32> to vector<64x128xf32>
      %47 = arith.addf %44, %46 : vector<64x128xf32>
      %48 = math.tanh %47 : vector<64x128xf32>
      %c0_29 = arith.constant 0 : index
      %c0_30 = arith.constant 0 : index
      %49 = vector.load %arg7[%c0_29, %c0_30] : memref<128x128xf32, #tpu.memory_space<vmem>>, vector<128x128xf32>
      %cst_31 = arith.constant dense<0.000000e+00> : vector<64x128xf32>
      %50 = tpu.matmul %48, %49, %cst_31 {dimension_numbers = #tpu.dot_dimension_numbers<[1], [0], [0], [1], [0, 0, 1, 1], [], []>} : vector<64x128xf32>, vector<128x128xf32>, vector<64x128xf32> -> vector<64x128xf32>
      %c0_32 = arith.constant 0 : index
      %c0_33 = arith.constant 0 : index
      %51 = vector.load %arg8[%c0_32, %c0_33] : memref<1x128xf32, #tpu.memory_space<vmem>>, vector<1x128xf32>
      %52 = vector.broadcast %51 : vector<1x128xf32> to vector<64x128xf32>
      %53 = arith.addf %50, %52 : vector<64x128xf32>
      %54 = math.tanh %53 : vector<64x128xf32>
      %c0_34 = arith.constant 0 : index
      %c0_35 = arith.constant 0 : index
      %55 = vector.load %arg9[%c0_34, %c0_35] : memref<128x128xf32, #tpu.memory_space<vmem>>, vector<128x128xf32>
      %cst_36 = arith.constant dense<0.000000e+00> : vector<64x128xf32>
      %56 = tpu.matmul %54, %55, %cst_36 {dimension_numbers = #tpu.dot_dimension_numbers<[1], [0], [0], [1], [0, 0, 1, 1], [], []>} : vector<64x128xf32>, vector<128x128xf32>, vector<64x128xf32> -> vector<64x128xf32>
      %c0_37 = arith.constant 0 : index
      %c0_38 = arith.constant 0 : index
      %57 = vector.load %arg10[%c0_37, %c0_38] : memref<1x128xf32, #tpu.memory_space<vmem>>, vector<1x128xf32>
      %58 = vector.broadcast %57 : vector<1x128xf32> to vector<64x128xf32>
      %59 = arith.addf %56, %58 : vector<64x128xf32>
      %60 = vector.broadcast %18 : f32 to vector<64x128xf32>
      %61 = arith.mulf %60, %59 : vector<64x128xf32>
      %62 = arith.addf %39, %61 : vector<64x128xf32>
      %63 = vector.broadcast %16 : f32 to vector<64x128xf32>
      %64 = arith.mulf %63, %59 : vector<64x128xf32>
      %65 = arith.addf %19, %64 : vector<64x128xf32>
      %c0_39 = arith.constant 0 : index
      %c0_40 = arith.constant 0 : index
      %66 = vector.load %arg5[%c0_39, %c0_40] : memref<128x128xf32, #tpu.memory_space<vmem>>, vector<128x128xf32>
      %cst_41 = arith.constant dense<0.000000e+00> : vector<64x128xf32>
      %67 = tpu.matmul %65, %66, %cst_41 {dimension_numbers = #tpu.dot_dimension_numbers<[1], [0], [0], [1], [0, 0, 1, 1], [], []>} : vector<64x128xf32>, vector<128x128xf32>, vector<64x128xf32> -> vector<64x128xf32>
      %c0_42 = arith.constant 0 : index
      %c0_43 = arith.constant 0 : index
      %68 = vector.load %arg6[%c0_42, %c0_43] : memref<1x128xf32, #tpu.memory_space<vmem>>, vector<1x128xf32>
      %69 = vector.broadcast %68 : vector<1x128xf32> to vector<64x128xf32>
      %70 = arith.addf %67, %69 : vector<64x128xf32>
      %71 = math.tanh %70 : vector<64x128xf32>
      %c0_44 = arith.constant 0 : index
      %c0_45 = arith.constant 0 : index
      %72 = vector.load %arg7[%c0_44, %c0_45] : memref<128x128xf32, #tpu.memory_space<vmem>>, vector<128x128xf32>
      %cst_46 = arith.constant dense<0.000000e+00> : vector<64x128xf32>
      %73 = tpu.matmul %71, %72, %cst_46 {dimension_numbers = #tpu.dot_dimension_numbers<[1], [0], [0], [1], [0, 0, 1, 1], [], []>} : vector<64x128xf32>, vector<128x128xf32>, vector<64x128xf32> -> vector<64x128xf32>
      %c0_47 = arith.constant 0 : index
      %c0_48 = arith.constant 0 : index
      %74 = vector.load %arg8[%c0_47, %c0_48] : memref<1x128xf32, #tpu.memory_space<vmem>>, vector<1x128xf32>
      %75 = vector.broadcast %74 : vector<1x128xf32> to vector<64x128xf32>
      %76 = arith.addf %73, %75 : vector<64x128xf32>
      %77 = math.tanh %76 : vector<64x128xf32>
      %c0_49 = arith.constant 0 : index
      %c0_50 = arith.constant 0 : index
      %78 = vector.load %arg9[%c0_49, %c0_50] : memref<128x128xf32, #tpu.memory_space<vmem>>, vector<128x128xf32>
      %cst_51 = arith.constant dense<0.000000e+00> : vector<64x128xf32>
      %79 = tpu.matmul %77, %78, %cst_51 {dimension_numbers = #tpu.dot_dimension_numbers<[1], [0], [0], [1], [0, 0, 1, 1], [], []>} : vector<64x128xf32>, vector<128x128xf32>, vector<64x128xf32> -> vector<64x128xf32>
      %c0_52 = arith.constant 0 : index
      %c0_53 = arith.constant 0 : index
      %80 = vector.load %arg10[%c0_52, %c0_53] : memref<1x128xf32, #tpu.memory_space<vmem>>, vector<1x128xf32>
      %81 = vector.broadcast %80 : vector<1x128xf32> to vector<64x128xf32>
      %82 = arith.addf %79, %81 : vector<64x128xf32>
      %83 = vector.broadcast %18 : f32 to vector<64x128xf32>
      %84 = arith.mulf %83, %82 : vector<64x128xf32>
      %85 = arith.addf %62, %84 : vector<64x128xf32>
      %86 = vector.broadcast %15 : f32 to vector<64x128xf32>
      %87 = arith.mulf %86, %82 : vector<64x128xf32>
      %88 = arith.addf %19, %87 : vector<64x128xf32>
      %c0_54 = arith.constant 0 : index
      %c0_55 = arith.constant 0 : index
      %89 = vector.load %arg5[%c0_54, %c0_55] : memref<128x128xf32, #tpu.memory_space<vmem>>, vector<128x128xf32>
      %cst_56 = arith.constant dense<0.000000e+00> : vector<64x128xf32>
      %90 = tpu.matmul %88, %89, %cst_56 {dimension_numbers = #tpu.dot_dimension_numbers<[1], [0], [0], [1], [0, 0, 1, 1], [], []>} : vector<64x128xf32>, vector<128x128xf32>, vector<64x128xf32> -> vector<64x128xf32>
      %c0_57 = arith.constant 0 : index
      %c0_58 = arith.constant 0 : index
      %91 = vector.load %arg6[%c0_57, %c0_58] : memref<1x128xf32, #tpu.memory_space<vmem>>, vector<1x128xf32>
      %92 = vector.broadcast %91 : vector<1x128xf32> to vector<64x128xf32>
      %93 = arith.addf %90, %92 : vector<64x128xf32>
      %94 = math.tanh %93 : vector<64x128xf32>
      %c0_59 = arith.constant 0 : index
      %c0_60 = arith.constant 0 : index
      %95 = vector.load %arg7[%c0_59, %c0_60] : memref<128x128xf32, #tpu.memory_space<vmem>>, vector<128x128xf32>
      %cst_61 = arith.constant dense<0.000000e+00> : vector<64x128xf32>
      %96 = tpu.matmul %94, %95, %cst_61 {dimension_numbers = #tpu.dot_dimension_numbers<[1], [0], [0], [1], [0, 0, 1, 1], [], []>} : vector<64x128xf32>, vector<128x128xf32>, vector<64x128xf32> -> vector<64x128xf32>
      %c0_62 = arith.constant 0 : index
      %c0_63 = arith.constant 0 : index
      %97 = vector.load %arg8[%c0_62, %c0_63] : memref<1x128xf32, #tpu.memory_space<vmem>>, vector<1x128xf32>
      %98 = vector.broadcast %97 : vector<1x128xf32> to vector<64x128xf32>
      %99 = arith.addf %96, %98 : vector<64x128xf32>
      %100 = math.tanh %99 : vector<64x128xf32>
      %c0_64 = arith.constant 0 : index
      %c0_65 = arith.constant 0 : index
      %101 = vector.load %arg9[%c0_64, %c0_65] : memref<128x128xf32, #tpu.memory_space<vmem>>, vector<128x128xf32>
      %cst_66 = arith.constant dense<0.000000e+00> : vector<64x128xf32>
      %102 = tpu.matmul %100, %101, %cst_66 {dimension_numbers = #tpu.dot_dimension_numbers<[1], [0], [0], [1], [0, 0, 1, 1], [], []>} : vector<64x128xf32>, vector<128x128xf32>, vector<64x128xf32> -> vector<64x128xf32>
      %c0_67 = arith.constant 0 : index
      %c0_68 = arith.constant 0 : index
      %103 = vector.load %arg10[%c0_67, %c0_68] : memref<1x128xf32, #tpu.memory_space<vmem>>, vector<1x128xf32>
      %104 = vector.broadcast %103 : vector<1x128xf32> to vector<64x128xf32>
      %105 = arith.addf %102, %104 : vector<64x128xf32>
      %106 = vector.broadcast %17 : f32 to vector<64x128xf32>
      %107 = arith.mulf %106, %105 : vector<64x128xf32>
      %108 = arith.addf %85, %107 : vector<64x128xf32>
      %c0_69 = arith.constant 0 : index
      %c0_70 = arith.constant 0 : index
      %109 = vector.load %arg12[%c0_69, %c0_70] : memref<64x128xf32, #tpu.memory_space<vmem>>, vector<64x128xf32>
      tpu.vector_store %arg12[%c0_69, %c0_70], %108 {strides = array<i32>} : memref<64x128xf32, #tpu.memory_space<vmem>>, vector<64x128xf32>,
      %110 = arith.index_cast %arg13 : i32 to index
      %c0_71 = arith.constant 0 : index
      %c0_72 = arith.constant 0 : index
      %111 = vector.load %arg11[%110, %c0_71, %c0_72] : memref<8x64x128xf32, #tpu.memory_space<vmem>>, vector<1x64x128xf32>
      %112 = vector.shape_cast %111 : vector<1x64x128xf32> to vector<64x128xf32>
      %113 = vector.shape_cast %108 : vector<64x128xf32> to vector<1x64x128xf32>
      tpu.vector_store %arg11[%110, %c0_71, %c0_72], %113 {strides = array<i32>} : memref<8x64x128xf32, #tpu.memory_space<vmem>>, vector<1x64x128xf32>,
    }
    %c8_i32_2 = arith.constant 8 : i32
    return
  }
  func.func @transform_0(%arg0: i32, %arg1: i32, %arg2: memref<8xf32, #tpu.memory_space<smem>>, %arg3: memref<2xf32, #tpu.memory_space<smem>>) -> (i32, i32) {
    %c0_i32 = arith.constant 0 : i32
    %c0_i32_0 = arith.constant 0 : i32
    return %arg0, %c0_i32 : i32, i32
  }
  func.func @transform_1(%arg0: i32, %arg1: i32, %arg2: memref<8xf32, #tpu.memory_space<smem>>, %arg3: memref<2xf32, #tpu.memory_space<smem>>) -> (i32, i32) {
    %c0_i32 = arith.constant 0 : i32
    %c0_i32_0 = arith.constant 0 : i32
    %c0_i32_1 = arith.constant 0 : i32
    return %c0_i32, %c0_i32_0 : i32, i32
  }
  func.func @transform_2(%arg0: i32, %arg1: i32, %arg2: memref<8xf32, #tpu.memory_space<smem>>, %arg3: memref<2xf32, #tpu.memory_space<smem>>) -> (i32, i32) {
    %c0_i32 = arith.constant 0 : i32
    %c0_i32_0 = arith.constant 0 : i32
    %c0_i32_1 = arith.constant 0 : i32
    return %c0_i32, %c0_i32_0 : i32, i32
  }
  func.func @transform_3(%arg0: i32, %arg1: i32, %arg2: memref<8xf32, #tpu.memory_space<smem>>, %arg3: memref<2xf32, #tpu.memory_space<smem>>) -> (i32, i32) {
    %c0_i32 = arith.constant 0 : i32
    %c0_i32_0 = arith.constant 0 : i32
    %c0_i32_1 = arith.constant 0 : i32
    return %c0_i32, %c0_i32_0 : i32, i32
  }
  func.func @transform_4(%arg0: i32, %arg1: i32, %arg2: memref<8xf32, #tpu.memory_space<smem>>, %arg3: memref<2xf32, #tpu.memory_space<smem>>) -> (i32, i32) {
    %c0_i32 = arith.constant 0 : i32
    %c0_i32_0 = arith.constant 0 : i32
    %c0_i32_1 = arith.constant 0 : i32
    return %c0_i32, %c0_i32_0 : i32, i32
  }
  func.func @transform_5(%arg0: i32, %arg1: i32, %arg2: memref<8xf32, #tpu.memory_space<smem>>, %arg3: memref<2xf32, #tpu.memory_space<smem>>) -> (i32, i32) {
    %c0_i32 = arith.constant 0 : i32
    %c0_i32_0 = arith.constant 0 : i32
    %c0_i32_1 = arith.constant 0 : i32
    return %c0_i32, %c0_i32_0 : i32, i32
  }
  func.func @transform_6(%arg0: i32, %arg1: i32, %arg2: memref<8xf32, #tpu.memory_space<smem>>, %arg3: memref<2xf32, #tpu.memory_space<smem>>) -> (i32, i32) {
    %c0_i32 = arith.constant 0 : i32
    %c0_i32_0 = arith.constant 0 : i32
    %c0_i32_1 = arith.constant 0 : i32
    return %c0_i32, %c0_i32_0 : i32, i32
  }
  func.func @transform_7(%arg0: i32, %arg1: i32, %arg2: memref<8xf32, #tpu.memory_space<smem>>, %arg3: memref<2xf32, #tpu.memory_space<smem>>) -> (i32, i32, i32) {
    %c0_i32 = arith.constant 0 : i32
    %c0_i32_0 = arith.constant 0 : i32
    return %arg1, %arg0, %c0_i32 : i32, i32, i32
  }
}

</mosaic_0001>

<bundles_post_ra>
// kernel: tpu_custom_call.1
= control target key start
LH: loop header
LB: loop body
LE: loop exit
PB: predicated region body
PF: predicated region fallthrough
CT: control target
= control target key end

     0   :  { %s4714_s0 = inlined_call_operand.hbm [shape: f32[8], index: 0, kind: input, shape index: {}]   ;;  %s4715_s2 = inlined_call_operand.hbm [shape: f32[128,128], index: 2, kind: input, shape index: {}]   ;;  %s4716_s3 = inlined_call_operand.hbm [shape: f32[128,128], index: 3, kind: input, shape index: {}]   ;;  %s4717_s4 = inlined_call_operand.vmem [shape: f32[1,128], index: 4, kind: input, shape index: {}]   ;;  %s4718_s5 = inlined_call_operand.hbm [shape: f32[128,128], index: 5, kind: input, shape index: {}]   ;;  %s4719_s6 = inlined_call_operand.vmem [shape: f32[1,128], index: 6, kind: input, shape index: {}]   ;;  %s4720_s7 = inlined_call_operand.hbm [shape: f32[128,128], index: 7, kind: input, shape index: {}]   ;;  %s4721_s8 = inlined_call_operand.vmem [shape: f32[1,128], index: 8, kind: input, shape index: {}]   ;;  %s4722_s9 = inlined_call_operand.hbm [shape: f32[8,128,128], index: 9, kind: output, shape index: {}]   ;;  %s4723_s1 = inlined_call_operand.vmem [shape: f32[2], index: 1, kind: input, shape index: {}]  }
   0x1   :  { %4731 = sst [smem:[#allocation24_spill]] %s4721_s8  ;;  %s3592_s11 = scalar_lea.hbm %s4714_s0, 16 }
   0x2   :  { %4732 = sst [smem:[#allocation25_spill]] %s4722_s9  ;;  %p3593_p0 = scmp.ne.s32.totalorder %s4714_s0, %s3592_s11 }
   0x3   :  { %p3596_p1 = scmp.lt.u32.totalorder %s3592_s11, %s4714_s0 }
   0x5   :  { %p3598_p2 = pnand %p3596_p1, %p3593_p0 }
   0x7   :  { %3601 = shalt.err (!%p3598_p2)  }
   0x8   :  { %s3802_s16 = smov [#allocation4]   ;;  %s16_s21 = sshll.u32 %s4723_s1, 4  ;;  %s17_s21 = int_to_ptr.vmem [resolvable:$true] %s16_s21 }
   0x9   :  { %15 = dma.hbm_to_smem %s4714_s0, 16, %s3802_s16, [#allocation3] }
   0xa   :  { %s3602_s22 = scalar_lea.vmem %s17_s21, 16  ;;  %p3607_p4 = scmp.lt.s32.totalorder %s17_s21, %s17_s21 }
   0xb   :  { %p3603_p3 = scmp.ne.s32.totalorder %s17_s21, %s3602_s22  ;;  %p3608_p5 = scmp.lt.s32.totalorder %s3602_s22, %s3602_s22 }
   0xd   :  { %p3609_p6 = por %p3608_p5, %p3607_p4 }
   0xf   :  { %p3610_p7 = pnand %p3609_p6, %p3603_p3 }
  0x11   :  { %3613 = shalt.err (!%p3610_p7)  }
  0x12   :  { %s3803_s23 = smov [#allocation5]  }
  0x13   :  { %19 = dma.vmem_to_smem %s17_s21, 16, %s3803_s23, [#allocation3] }
  0x14   :  { %3756 = dma.done.wait [#allocation3], 32 }
  0x15   :  { %3757 = vsyncadd [#allocation3], 4294967264 }
  0x16   :  { %21 = sfence }
  0x17   :  { %22 = vsyncpa [#allocation7], 0 }
  0x18   :  { %24 = vsyncpa [#allocation7 + $0x1], 0 }
  0x19   :  { %25 = vsyncpa [#allocation10], 0 }
  0x1a   :  { %26 = vsyncpa [#allocation13], 0 }
  0x1b   :  { %27 = vsyncpa [#allocation8], 0 }
  0x1c   :  { %29 = vsyncpa [#allocation8 + $0x1], 0  ;;  %s3881_s0 = smov 0   ;;  %s3883_s1 = smov 0  }
  0x1d   :  { %s3885_s24 = smov 0   ;;  %s3887_s25 = smov 0  }
  0x1e   :  { %s3889_s26 = smov 0   ;;  %s3891_s27 = smov 0  }
  0x1f LB: > { %4733 = sst [smem:[#allocation22_spill]] %s3776_s0  ;;  %s2108_s28 = sadd.s32 4294967295, %s3796_s27   ;;  %s3796_s27 = sphi %s3891_s27, %s35_s27   ;;  %s3792_s26 = sphi %s3889_s26, %s4758_s26   ;;  %s3788_s25 = sphi %s3887_s25, %s4757_s25   ;;  %s3784_s24 = sphi %s3885_s24, %s4756_s24   ;;  %s3780_s1 = sphi %s3883_s1, %s4755_s1   ;;  %s3776_s0 = sphi %s3881_s0, %s4754_s0  }
  0x20   : > { %s2109_s29 = sadd.s32 4294967294, %s3796_s27   ;;  %p67_p8 = scmp.ne.s32.totalorder %s3780_s1, %s3776_s0 }
  0x21   : > { %p3915_p9 = scmp.eq.s32.totalorder %s2108_s28, 0  ;;  %p3919_p10 = scmp.eq.s32.totalorder %s2108_s28, 1 }
  0x22   : > { %p225_p11 = scmp.eq.s32.totalorder %s2109_s29, 1  ;;  %p2110_p13 = scmp.ge.s32.totalorder %s3796_s27, 1 }
  0x23   : > { %s4734_s30 = scalar_select %p3915_p9, 1, 0 }
  0x24   : > { %s4735_s10 = scalar_select %p3919_p10, 1, 0 }
  0x25   : > { %p3925_p12 = por %p3915_p9, %p67_p8  ;;  %p3930_p0 = por %p225_p11, %p67_p8 }
  0x26   : > { %p232_p1 = scmp.lt.s32.totalorder %s3796_s27, 3  ;;  %s3804_s14 = smov [#allocation9]  }
  0x27   : > { %s4736_s11 = scalar_select %p3925_p12, 1, 0 }
  0x28   : > { %s4737_s12 = scalar_select %p3930_p0, 1, 0 }
  0x29   : > { %p3935_p2 = pnand %p2110_p13, %p232_p1  ;;  %s244_s15 = sshll.u32 %s3804_s14, 4  ;;  %s3939_s15 = int_to_ptr.vmem [resolvable:$true] %s244_s15 }
  0x2a   : > { %4738 = sst [smem:[#allocation23_spill]] %s4737_s12  ;;  %s3805_s17 = smov [#allocation11]  }
  0x2b   : > { %s4739_s13 = scalar_select %p3935_p2, 1, 0 }
  0x2c   : > { %p3358_p3 = pneg %p3935_p2  ;;  %s260_s18 = sshll.u32 %s3805_s17, 4  ;;  %s3950_s18 = int_to_ptr.vmem [resolvable:$true] %s260_s18 }
  0x2d   : > { %s3806_s19 = smov [#allocation12]   ;;  %s3614_s23 = scalar_lea.hbm %s4716_s3, 2048 }
  0x2e   : > { %p3946_p5 = pnand %p3358_p3, %p3915_p9  ;;  %s3952_s20 = sshll.u32 %s3806_s19, 4  ;;  %s277_s20 = int_to_ptr.vmem [resolvable:$true] %s3952_s20 }
  0x2f   : > { %p3615_p6 = scmp.ne.s32.totalorder %s4716_s3, %s3614_s23  ;;  %p3621_p13 = scmp.lt.u32.totalorder %s3614_s23, %s4716_s3 }
  0x30   : > { %p3962_p7 = pneg %p3946_p5 }
  0x32   : > { %p3617_p8 = pnand %p3962_p7, %p3615_p6 }
  0x34   : > { %p3618_p11 = pneg %p3617_p8 }
  0x36   : > { %p3623_p1 = pnand %p3621_p13, %p3618_p11 }
  0x38   : > { %3626 = shalt.err (!%p3623_p1)
}
  0x39   : > { %s3627_s21 = scalar_lea.vmem %s3939_s15, 2048  ;;  %p3635_p9 = scmp.lt.s32.totalorder %s3939_s15, %s3939_s15 }
  0x3a   : > { %p3628_p3 = scmp.ne.s32.totalorder %s3939_s15, %s3627_s21  ;;  %p3636_p12 = scmp.lt.s32.totalorder %s3627_s21, %s3627_s21 }
  0x3c   : > { %p3630_p4 = pnand %p3628_p3, %p3962_p7  ;;  %p3637_p6 = por %p3636_p12, %p3635_p9 }
  0x3e   : > { %p3631_p0 = pneg %p3630_p4 }
  0x40   : > { %p3638_p8 = pnand %p3637_p6, %p3631_p0 }
  0x42   : > { %3641 = shalt.err (!%p3638_p8)
}
  0x43   : > { %s3807_s22 = smov 128   ;;  %s3808_s23 = smov 8  }
  0x44   : > { %3361 = dma.hbm_to_vmem [thread:$0]  (!%p3946_p5), %s4716_s3, 2048, %s3939_s15, [#allocation10], %s3807_s22, %s3807_s22, %s3808_s23  }
  0x45   : > { %s3642_s21 = scalar_lea.hbm %s4718_s5, 2048 }
  0x46   : > { %p3643_p9 = scmp.ne.s32.totalorder %s4718_s5, %s3642_s21  ;;  %p3649_p4 = scmp.lt.u32.totalorder %s3642_s21, %s4718_s5 }
  0x48   : > { %p3645_p12 = pnand %p3643_p9, %p3962_p7 }
  0x4a   : > { %p3646_p0 = pneg %p3645_p12 }
  0x4c   : > { %p3651_p11 = pnand %p3649_p4, %p3646_p0 }
  0x4e   : > { %3654 = shalt.err (!%p3651_p11)
}
  0x4f   : > { %s3655_s15 = scalar_lea.vmem %s3950_s18, 2048  ;;  %p3663_p6 = scmp.lt.s32.totalorder %s3950_s18, %s3950_s18 }
  0x50   : > { %p3656_p13 = scmp.ne.s32.totalorder %s3950_s18, %s3655_s15  ;;  %p3664_p8 = scmp.lt.s32.totalorder %s3655_s15, %s3655_s15 }
  0x52   : > { %p3658_p1 = pnand %p3656_p13, %p3962_p7  ;;  %p3665_p9 = por %p3664_p8, %p3663_p6 }
  0x54   : > { %p3659_p3 = pneg %p3658_p1 }
  0x56   : > { %p3666_p12 = pnand %p3665_p9, %p3659_p3 }
  0x58   : > { %3669 = shalt.err (!%p3666_p12)
}
  0x59   : > { %3364 = dma.hbm_to_vmem [thread:$0]  (!%p3946_p5), %s4718_s5, 2048, %s3950_s18, [#allocation10], %s3807_s22, %s3807_s22, %s3808_s23  }
  0x5a   : > { %s3670_s28 = scalar_lea.hbm %s4720_s7, 2048 }
  0x5b   : > { %p3671_p0 = scmp.ne.s32.totalorder %s4720_s7, %s3670_s28  ;;  %p3677_p13 = scmp.lt.u32.totalorder %s3670_s28, %s4720_s7 }
  0x5d   : > { %p3673_p4 = pnand %p3671_p0, %p3962_p7 }
  0x5f   : > { %p3674_p11 = pneg %p3673_p4 }
  0x61   : > { %p3679_p1 = pnand %p3677_p13, %p3674_p11 }
  0x63   : > { %3682 = shalt.err (!%p3679_p1)
}
  0x64   : > { %s3683_s15 = scalar_lea.vmem %s277_s20, 2048  ;;  %p3691_p9 = scmp.lt.s32.totalorder %s277_s20, %s277_s20 }
  0x65   : > { %p3684_p3 = scmp.ne.s32.totalorder %s277_s20, %s3683_s15  ;;  %p3692_p12 = scmp.lt.s32.totalorder %s3683_s15, %s3683_s15 }
  0x67   : > { %p3686_p6 = pnand %p3684_p3, %p3962_p7  ;;  %p3693_p2 = por %p3692_p12, %p3691_p9 }
  0x69   : > { %p3687_p8 = pneg %p3686_p6 }
  0x6b   : > { %p3694_p10 = pnand %p3693_p2, %p3687_p8 }
  0x6d   : > { %3697 = shalt.err (!%p3694_p10)
}
  0x6e   : > { %3367 = dma.hbm_to_vmem [thread:$0]  (!%p3946_p5), %s4720_s7, 2048, %s277_s20, [#allocation13], %s3807_s22, %s3807_s22, %s3808_s23  }
  0x6f   : > { %s54_s14 = sadd.s32 1, %s3784_s24  ;;  %s47_s16 = sadd.s32 1, %s3792_s26 }
  0x70   : > { %p61_p10 = scmp.ne.s32.totalorder %s3784_s24, %s3780_s1  ;;  %p49_p2 = scmp.ge.s32.totalorder %s47_s16, 2 }
  0x71   : > { %p62_p7 = scmp.eq.s32.totalorder %s3796_s27, 0  ;;  %p4742_p0 = scmp.ne.s32.totalorder %s4735_s10, 0 }
  0x72   : > { %p3379_p11 = scmp.lt.s32.totalorder %s3796_s27, 2  ;;  %s4760_s16 = smov (%p49_p2, %s47_s16), 0 }
  0x73   : > { %p4041_p4 = por %p4742_p0, %p61_p10  ;;  %p63_p13 = por %p62_p7, %p61_p10 }
  0x74   : > { %s293_s0 = sand.u32 1, %s3784_s24   ;;  %s51_s12 = ssub.s32 %s3792_s26, %s4760_s16 }
  0x75   : > { %p52_p1 = scmp.eq.s32.totalorder %s51_s12, 0  ;;  %s2115_s20 = sshll.u32 %s293_s0, 6 }
  0x76   : > { %s2134_s28 = sshll.u32 %s3792_s26, 10  ;;  %s297_s21 = scalar_lea.vmem [#allocation6], %s2115_s20 }
  0x77   : > { %s4053_s29 = scalar_select %p52_p1, %s3784_s24, %s54_s14  }
  0x78   : > { %s4058_s10 = scalar_lea.hbm %s4715_s2, %s2134_s28  ;;  %s304_s15 = sshll.u32 %s297_s21, 4  ;;  %s4060_s15 = int_to_ptr.vmem [resolvable:$true] %s304_s15 }
  0x79   : > { %p4064_p5 = pnand %p3379_p11, %p63_p13  ;;  %s4068_s8 = scalar_lea.sflag [#allocation7], %s293_s0 }
  0x7a   : > { %s3698_s14 = scalar_lea.hbm %s4058_s10, 1024  ;;  %s3703_s28 = scalar_lea.hbm %s4715_s2, 2048 }
  0x7b   : > { %p3699_p3 = scmp.ne.s32.totalorder %s4058_s10, %s3698_s14  ;;  %p3700_p6 = pneg %p4064_p5 }
  0x7c   : > { %p3704_p12 = scmp.lt.u32.totalorder %s4058_s10, %s4715_s2  ;;  %p3705_p10 = scmp.lt.u32.totalorder %s3703_s28, %s3698_s14 }
  0x7d   : > { %p3701_p8 = pnand %p3700_p6, %p3699_p3  ;;  %p3707_p7 = scmp.lt.u32.totalorder %s3698_s14, %s4058_s10 }
  0x7e   : > { %p3706_p2 = por %p3705_p10, %p3704_p12 }
  0x7f   : > { %p3702_p9 = pneg %p3701_p8 }
  0x80   : > { %p3708_p0 = por %p3707_p7, %p3706_p2 }
  0x82   : > { %p3709_p11 = pnand %p3708_p0, %p3702_p9 }
  0x84   : > { %3712 = shalt.err (!%p3709_p11)
}
  0x85   : > { %s3713_s0 = scalar_lea.vmem %s4060_s15, 1024  ;;  %s3809_s21 = smov [#allocation6]  }
  0x86   : > { %p3714_p13 = scmp.ne.s32.totalorder %s4060_s15, %s3713_s0  ;;  %s3718_s12 = sshll.u32 %s3809_s21, 4  ;;  %s3719_s12 = int_to_ptr.vmem [resolvable:$false] %s3718_s12 }
  0x87   : > { %s3720_s20 = scalar_lea.vmem %s3719_s12, 2048  ;;  %p3721_p8 = scmp.lt.s32.totalorder %s4060_s15, %s3719_s12 }
  0x88   : > { %p3716_p1 = pnand %p3714_p13, %p3700_p6  ;;  %p3722_p12 = scmp.lt.s32.totalorder %s3720_s20, %s3713_s0 }
  0x8a   : > { %p3717_p3 = pneg %p3716_p1  ;;  %p3723_p10 = por %p3722_p12, %p3721_p8 }
  0x8c   : > { %p3724_p2 = pnand %p3723_p10, %p3717_p3 }
  0x8e   : > { %3727 = shalt.err (!%p3724_p2)
}
  0x8f   : > { %3371 = dma.hbm_to_vmem [thread:$0]  (!%p4064_p5), %s4058_s10, 1024, %s4060_s15, %s4068_s8, %s3807_s22, %s3807_s22, %s3808_s23  }
  0x90   : > { %p4745_p6 = scmp.ne.s32.totalorder %s4739_s13, 0 }
  0x91   : > { %s4102_s14 = sand.u32 (!%p4745_p6), 1, %s3780_s1   ;;  %p4746_p9 = scmp.ne.s32.totalorder (!%p4745_p6), %s4736_s11, 0 }
  0x92   : > { %316 = sbr.rel (%p4745_p6) target bundleno = 2916 (0xb64), region = 48  ;;  %s2119_s28 = sshll.u32 (!%p4745_p6), %s4102_s14, 6 }
  0x93   : > { %s319_s17 = scalar_lea.sflag (!%p4745_p6), [#allocation7], %s4102_s14  ;;  %s322_s19 = scalar_lea.vmem (!%p4745_p6), [#allocation6], %s2119_s28 }
  0x99   : > { %3759 = dma.done.wait (%p4746_p9), %s319_s17, 1024  }
  0x9a   : > { %3761 = vsyncadd (%p4746_p9), %s319_s17, 4294966272  ;;  %p4747_p7 = scmp.ne.s32.totalorder %s4734_s30, 0 }
  0x9c   : > { %3763 = dma.done.wait (%p4747_p7), [#allocation10], 4096  }
  0x9d   : > { %3765 = vsyncadd (%p4747_p7), [#allocation10], 4294963200 }
  0x9e   : > { %3767 = dma.done.wait (%p4747_p7), [#allocation13], 2048  }
  0x9f   : > { %3769 = vsyncadd (%p4747_p7), [#allocation13], 4294965248  ;;  %s2123_s13 = sshll.u32 %s4102_s14, 9  ;;  %s4120_s22 = sld [smem:[#allocation5 + %s3788_s25]]  ;;  %v373_v0 = vld [vmem:[%s322_s19] sm:$0xff]  ;;  %v374_v1 = vld [vmem:[%s322_s19 + $0x8] sm:$0xff] }
  0xa0   : > { %v375_v2 = vld [vmem:[%s322_s19 + $0x10] sm:$0xff]  ;;  %381 = vst [vmem:[#allocation2] sm:$0xff] %v373_v0  ;;  %382 = vst [vmem:[#allocation2 + $0x8] sm:$0xff] %v374_v1  ;;  %v376_v3 = vld [vmem:[%s322_s19 + $0x18] sm:$0xff]  ;;  %s4122_s30 = scalar_lea.vmem [#allocation14], %s2123_s13  ;;  %s4124_s11 = smov 0  }
  0xa1   : > { %383 = vst [vmem:[#allocation2 + $0x10] sm:$0xff] %v375_v2  ;;  %v377_v4 = vld [vmem:[%s322_s19 + $0x20] sm:$0xff]  ;;  %v378_v5 = vld [vmem:[%s322_s19 + $0x28] sm:$0xff]  ;;  %384 = vst [vmem:[#allocation2 + $0x18] sm:$0xff] %v376_v3 }
  0xa2   : > { %385 = vst [vmem:[#allocation2 + $0x20] sm:$0xff] %v377_v4  ;;  %386 = vst [vmem:[#allocation2 + $0x28] sm:$0xff] %v378_v5  ;;  %v379_v6 = vld [vmem:[%s322_s19 + $0x30] sm:$0xff]  ;;  %v380_v7 = vld [vmem:[%s322_s19 + $0x38] sm:$0xff] }
  0xa3   : > { %387 = vst [vmem:[#allocation2 + $0x30] sm:$0xff] %v379_v6  ;;  %388 = vst [vmem:[#allocation2 + $0x38] sm:$0xff] %v380_v7 }
  0xa4 LB: >> { %v415_v8 = vld [vmem:[#allocation9] sm:$0xff]  ;;  %v416_v9 = vld [vmem:[#allocation9 + $0x8] sm:$0xff]  ;;  %v417_v10 = vld [vmem:[#allocation9 + $0x10] sm:$0xff]  ;;  %s2124_s8 = sadd.s32 4294967295, %s3800_s11  ;;  %s400_s0 = sld [smem:[#allocation4 + %s3800_s11]]  ;;  %s3800_s11 = sphi %s4124_s11, %s394_s11  }
  0xa5   : >> { %v4129_v11 = vpack.c.bf16 %v416_v9, %v415_v8  ;;  %v418_v12 = vld [vmem:[#allocation9 + $0x18] sm:$0xff]  ;;  %v419_v14 = vld [vmem:[#allocation9 + $0x20] sm:$0xff]  ;;  %v420_v15 = vld [vmem:[#allocation9 + $0x28] sm:$0xff]  ;;  %p398_p5 = scmp.gt.s32.totalorder %s2124_s8, 0  ;;  %s4748_s13 = sld [smem:[#allocation24_spill]] }
  0xa6   : >> { %v4131_v13 = vpack.c.bf16 %v418_v12, %v417_v10  ;;  %v4136_v16 = vpack.c.bf16 %v420_v15, %v419_v14  ;;  %v421_v18 = vld [vmem:[#allocation9 + $0x30] sm:$0xff]  ;;  %v422_v19 = vld [vmem:[#allocation9 + $0x38] sm:$0xff]  ;;  %v551_v20 = vld [vmem:[#allocation11] sm:$0xff] }
  0xa7   : >> { %2953 = vmatprep.subr.bf16.mxu0 %v4129_v11  ;;  %v4138_v17 = vld [vmem:[#allocation2] sm:$0xff]  ;;  %v552_v21 = vld [vmem:[#allocation11 + $0x8] sm:$0xff]  ;;  %v553_v22 = vld [vmem:[#allocation11 + $0x10] sm:$0xff]  ;;  %v4143_v23 = vpack.c.bf16 %v422_v19, %v421_v18  ;;  %s4762_s8 = smov (!%p398_p5, %s2124_s8), 0 }
  0xa8   : >> { %2955 = vmatpush3.bf16.msra.mxu0 %v4129_v11  ;;  %2456 = vmatprep.mubr.f32.mxu0 %v4138_v17  ;;  %v423_v24 = vld [vmem:[#allocation9 + $0x40] sm:$0xff]  ;;  %v4145_v25 = vpack.c.bf16 %v552_v21, %v551_v20  ;;  %v554_v26 = vld [vmem:[#allocation11 + $0x18] sm:$0xff]  ;;  %v424_v27 = vld [vmem:[#allocation9 + $0x48] sm:$0xff]  ;;  %s401_s21 = sld [smem:[#allocation4 + %s4762_s8]] }
  0xa9   : >> { %2957 = vmatprep.subr.bf16.mxu0 %v4131_v13  ;;  %v4147_v28 = vpack.c.bf16 %v554_v26, %v553_v22  ;;  %v555_v29 = vld [vmem:[#allocation11 + $0x20] sm:$0xff]  ;;  %v556_v30 = vld [vmem:[#allocation11 + $0x28] sm:$0xff]  ;;  %v4153_v31 = vpack.c.bf16 %v424_v27, %v423_v24  ;;  %v425_v32 = vld [vmem:[#allocation9 + $0x50] sm:$0xff] }
  0xaa   : >> { %2985 = vmatprep.subr.bf16.mxu1 %v4145_v25  ;;  %v4156_v33 = vpack.c.bf16 %v556_v30, %v555_v29  ;;  %v426_v34 = vld [vmem:[#allocation9 + $0x58] sm:$0xff]  ;;  %v557_v35 = vld [vmem:[#allocation11 + $0x30] sm:$0xff]  ;;  %v427_v39 = vld [vmem:[#allocation9 + $0x60] sm:$0xff] }
  0xab   : >> { %2987 = vmatpush3.bf16.msra.mxu1 %v4145_v25  ;;  %v558_v36 = vld [vmem:[#allocation11 + $0x38] sm:$0xff]  ;;  %v4161_v37 = vpack.c.bf16 %v426_v34, %v425_v32  ;;  %v428_v40 = vld [vmem:[#allocation9 + $0x68] sm:$0xff]  ;;  %v429_v42 = vld [vmem:[#allocation9 + $0x70] sm:$0xff] }
  0xac   : >> { %2959 = vmatpush3.bf16.msra.mxu0 %v4131_v13  ;;  %2989 = vmatprep.subr.bf16.mxu1 %v4147_v28  ;;  %v4164_v38 = vpack.c.bf16 %v558_v36, %v557_v35  ;;  %v4169_v41 = vpack.c.bf16 %v428_v40, %v427_v39  ;;  %v430_v43 = vld [vmem:[#allocation9 + $0x78] sm:$0xff]  ;;  %v4180_v45 = vld [vmem:[#allocation2 + $0x8] sm:$0xff]  ;;  %v4182_v46 = vld [vmem:[#allocation2 + $0x10] sm:$0xff] }
  0xad   : >> { %2961 = vmatprep.subr.bf16.mxu0 %v4136_v16  ;;  %v4175_v44 = vpack.c.bf16 %v430_v43, %v429_v42  ;;  %v4186_v47 = vld [vmem:[#allocation2 + $0x18] sm:$0xff]  ;;  %v4188_v48 = vld [vmem:[#allocation2 + $0x20] sm:$0xff]  ;;  %v4192_v49 = vld [vmem:[#allocation2 + $0x28] sm:$0xff] }
  0xae   : >> { %v4194_v50 = vld [vmem:[#allocation2 + $0x30] sm:$0xff]  ;;  %v4198_v51 = vld [vmem:[#allocation2 + $0x38] sm:$0xff]  ;;  %v559_v52 = vld [vmem:[#allocation11 + $0x40] sm:$0xff]  ;;  %s402_s12 = ssub.f32 %s400_s0, %s401_s21 }
  0xaf   : >> { %2991 = vmatpush3.bf16.msra.mxu1 %v4147_v28  ;;  %v560_v53 = vld [vmem:[#allocation11 + $0x48] sm:$0xff]  ;;  %v561_v55 = vld [vmem:[#allocation11 + $0x50] sm:$0xff]  ;;  %v562_v56 = vld [vmem:[#allocation11 + $0x58] sm:$0xff] }
  0xb0   : >> { %2963 = vmatpush3.bf16.msra.mxu0 %v4136_v16  ;;  %2993 = vmatprep.subr.bf16.mxu1 %v4156_v33  ;;  %v4201_v54 = vpack.c.bf16 %v560_v53, %v559_v52  ;;  %v4205_v57 = vpack.c.bf16 %v562_v56, %v561_v55  ;;  %v563_v58 = vld [vmem:[#allocation11 + $0x60] sm:$0xff]  ;;  %v564_v59 = vld [vmem:[#allocation11 + $0x68] sm:$0xff]  ;;  %v565_v61 = vld [vmem:[#allocation11 + $0x70] sm:$0xff]  ;;  %s4312_s20 = smul.f32 %s402_s12, %s4120_s22 }
  0xb1   : >> { %2965 = vmatprep.subr.bf16.mxu0 %v4143_v23  ;;  %v4209_v60 = vpack.c.bf16 %v564_v59, %v563_v58  ;;  %v566_v62 = vld [vmem:[#allocation11 + $0x78] sm:$0xff]  ;;  %v687_v0 = vld [vmem:[#allocation12] sm:$0xff]  ;;  %v688_v1 = vld [vmem:[#allocation12 + $0x8] sm:$0xff] }
  0xb2   : >> { %v4213_v63 = vpack.c.bf16 %v566_v62, %v565_v61  ;;  %v689_v2 = vld [vmem:[#allocation12 + $0x10] sm:$0xff]  ;;  %v4218_v3 = vpack.c.bf16 %v688_v1, %v687_v0  ;;  %v690_v4 = vld [vmem:[#allocation12 + $0x18] sm:$0xff]  ;;  %v691_v6 = vld [vmem:[#allocation12 + $0x20] sm:$0xff]  ;;  %s404_s28 = smul.f32 0.5, %s4312_s20 }
  0xb3   : >> { %2995 = vmatpush3.bf16.msra.mxu1 %v4156_v33  ;;  %v4220_v5 = vpack.c.bf16 %v690_v4, %v689_v2  ;;  %v692_v7 = vld [vmem:[#allocation12 + $0x28] sm:$0xff]  ;;  %v693_v9 = vld [vmem:[#allocation12 + $0x30] sm:$0xff]  ;;  %v694_v10 = vld [vmem:[#allocation12 + $0x38] sm:$0xff]  ;;  %s405_s23 = smul.f32 0.16666667, %s4312_s20 }
  0xb4   : >> { %2967 = vmatpush3.bf16.msra.mxu0 %v4143_v23  ;;  %2997 = vmatprep.subr.bf16.mxu1 %v4164_v38  ;;  %v4225_v8 = vpack.c.bf16 %v692_v7, %v691_v6  ;;  %v4229_v12 = vpack.c.bf16 %v694_v10, %v693_v9  ;;  %v4237_v14 = vld [vmem:[%s4717_s4] ss:$0 sm:$0xff]  ;;  %v696_v61 = vld [vmem:[#allocation12 + $0x48] sm:$0xff]  ;;  %v697_v0 = vld [vmem:[#allocation12 + $0x50] sm:$0xff]  ;;  %s406_s10 = smul.f32 0.33333334, %s4312_s20 }
  0xb5   : >> { %2969 = vmatprep.subr.bf16.mxu0 %v4153_v31  ;;  %v695_v59 = vld [vmem:[#allocation12 + $0x40] sm:$0xff]  ;;  %v698_v1 = vld [vmem:[#allocation12 + $0x58] sm:$0xff]  ;;  %v700_v6 = vld [vmem:[#allocation12 + $0x68] sm:$0xff] }
  0xb6   : >> { %v4263_v62 = vpack.c.bf16 %v696_v61, %v695_v59  ;;  %v4267_v2 = vpack.c.bf16 %v698_v1, %v697_v0  ;;  %v699_v4 = vld [vmem:[#allocation12 + $0x60] sm:$0xff]  ;;  %v701_v9 = vld [vmem:[#allocation12 + $0x70] sm:$0xff]  ;;  %v702_v10 = vld [vmem:[#allocation12 + $0x78] sm:$0xff] }
  0xb7   : >> { %2999 = vmatpush3.bf16.msra.mxu1 %v4164_v38  ;;  %v4271_v7 = vpack.c.bf16 %v700_v6, %v699_v4  ;;  %v4318_v0 = vld [vmem:[%s4748_s13] ss:$0 sm:$0xff]  ;;  %v4320_v4 = vstv %s404_s28 }
  0xb8   : >> { %2971 = vmatpush3.bf16.msra.mxu0 %v4153_v31  ;;  %3001 = vmatprep.subr.bf16.mxu1 %v4201_v54 }
  0xb9   : >> { %2973 = vmatprep.subr.bf16.mxu0 %v4161_v37 }
  0xbb   : >> { %3003 = vmatpush3.bf16.msra.mxu1 %v4201_v54 }
  0xbc   : >> { %2975 = vmatpush3.bf16.msra.mxu0 %v4161_v37  ;;  %3005 = vmatprep.subr.bf16.mxu1 %v4205_v57 }
  0xbd   : >> { %2977 = vmatprep.subr.bf16.mxu0 %v4169_v41 }
  0xbf   : >> { %3007 = vmatpush3.bf16.msra.mxu1 %v4205_v57 }
  0xc0   : >> { %2979 = vmatpush3.bf16.msra.mxu0 %v4169_v41  ;;  %3009 = vmatprep.subr.bf16.mxu1 %v4209_v60 }
  0xc1   : >> { %2981 = vmatprep.subr.bf16.mxu0 %v4175_v44 }
  0xc3   : >> { %3011 = vmatpush3.bf16.msra.mxu1 %v4209_v60 }
  0xc4   : >> { %2983 = vmatpush3.bf16.msra.mxu0 %v4175_v44  ;;  %3013 = vmatprep.subr.bf16.mxu1 %v4213_v63 }
  0xc5   : >> { %3017 = vmatprep.subr.bf16.mxu0 %v4218_v3 }
  0xc7   : >> { %2457 = vmatmul.mubr.f32.vlgmr.msra.gmra.mrb[0].mxu0 %v4180_v45  ;;  %3015 = vmatpush3.bf16.msra.mxu1 %v4213_v63 }
  0xc8   : >> { %2459 = vmatprep.mubr.f32.mxu0 %v4182_v46  ;;  %3049 = vmatprep.subr.bf16.mxu1 %v4129_v11 }
  0xc9   : >> { %3019 = vmatpush3.bf16.msra.mxu0 %v4218_v3 }
  0xca   : >> { %3021 = vmatprep.subr.bf16.mxu0 %v4220_v5 }
  0xcb   : >> { %2460 = vmatmul.mubr.f32.gmra.mrb[2].mxu0 %v4186_v47 }
  0xcc   : >> { %2462 = vmatprep.mubr.f32.mxu0 %v4188_v48 }
  0xcd   : >> { %3023 = vmatpush3.bf16.msra.mxu0 %v4220_v5 }
  0xce   : >> { %3025 = vmatprep.subr.bf16.mxu0 %v4225_v8 }
  0xcf   : >> { %2463 = vmatmul.mubr.f32.gmra.mrb[4].mxu0 %v4192_v49 }
  0xd0   : >> { %2465 = vmatprep.mubr.f32.mxu0 %v4194_v50 }
  0xd1   : >> { %3027 = vmatpush3.bf16.msra.mxu0 %v4225_v8 }
  0xd2   : >> { %3029 = vmatprep.subr.bf16.mxu0 %v4229_v12 }
  0xd3   : >> { %2466 = vmatmul.mubr.f32.gmra.mrb[6].mxu0 %v4198_v51 }
  0xd5   : >> { %3031 = vmatpush3.bf16.msra.mxu0 %v4229_v12 }
  0xd6   : >> { %3033 = vmatprep.subr.bf16.mxu0 %v4263_v62 }
  0xd9   : >> { %3035 = vmatpush3.bf16.msra.mxu0 %v4263_v62 }
  0xda   : >> { %3037 = vmatprep.subr.bf16.mxu0 %v4267_v2 }
  0xdd   : >> { %3039 = vmatpush3.bf16.msra.mxu0 %v4267_v2 }
  0xde   : >> { %3041 = vmatprep.subr.bf16.mxu0 %v4271_v7 }
  0xe1   : >> { %3043 = vmatpush3.bf16.msra.mxu0 %v4271_v7 }
 0x19a   : >> { %v2458_v15 = vpop.f32.mrb[0].mxu0 }
 0x19b   : >> { %v510_v18 = vadd.f32 %v2458_v15, %v4237_v14  ;;  %v504_v19 = vpop.f32.mrb[1].mxu0  ;;  %v4275_v15 = vpack.c.bf16 %v702_v10, %v701_v9 }
 0x19c   : >> { %v505_v20 = vadd.f32 %v4237_v14, %v504_v19 }
 0x19d   : >> { %3045 = vmatprep.subr.bf16.mxu0 %v4275_v15 }
 0x19e   : >> { %3453 = vtanh.f32 %v505_v20  ;;  %v2461_v21 = vpop.f32.mrb[2].mxu0  ;;  %3047 = vmatpush3.bf16.msra.mxu0 %v4275_v15 }
 0x19f   : >> { %3455 = vtanh.f32 %v510_v18  ;;  %v520_v22 = vadd.f32 %v2461_v21, %v4237_v14  ;;  %v514_v24 = vpop.f32.mrb[3].mxu0  ;;  %3081 = vmatprep.subr.bf16.mxu0 %v4145_v25  ;;  %v4283_v18 = vld [vmem:[%s4719_s6] ss:$0 sm:$0xff] }
 0x1a0   : >> { %v515_v26 = vadd.f32 %v4237_v14, %v514_v24 }
 0x1a2   : >> { %3457 = vtanh.f32 %v515_v26  ;;  %v2464_v27 = vpop.f32.mrb[4].mxu0 }
 0x1a3   : >> { %3459 = vtanh.f32 %v520_v22  ;;  %v530_v29 = vadd.f32 %v2464_v27, %v4237_v14  ;;  %v524_v30 = vpop.f32.mrb[5].mxu0 }
 0x1a4   : >> { %v525_v32 = vadd.f32 %v4237_v14, %v524_v30 }
 0x1a6   : >> { %3461 = vtanh.f32 %v525_v32  ;;  %v2467_v34 = vpop.f32.mrb[6].mxu0 }
 0x1a7   : >> { %3463 = vtanh.f32 %v530_v29  ;;  %v540_v35 = vadd.f32 %v2467_v34, %v4237_v14  ;;  %v534_v36 = vpop.f32.mrb[7].mxu0 }
 0x1a8   : >> { %v3454_v39 = vpop.eup %3453  ;;  %v535_v40 = vadd.f32 %v4237_v14, %v534_v36 }
 0x1a9   : >> { %v3456_v42 = vpop.eup %3455  ;;  %2500 = vmatprep.mubr.f32.mxu1 %v3454_v39 }
 0x1aa   : >> { %3465 = vtanh.f32 %v535_v40  ;;  %2501 = vmatmul.mubr.f32.vlgmr.msra.gmra.mrb[0].mxu1 %v3456_v42 }
 0x1ab   : >> { %3467 = vtanh.f32 %v540_v35  ;;  %3051 = vmatpush3.bf16.msra.mxu1 %v4129_v11 }
 0x1ac   : >> { %v3458_v43 = vpop.eup %3457  ;;  %3053 = vmatprep.subr.bf16.mxu1 %v4131_v13 }
 0x1ad   : >> { %v3460_v52 = vpop.eup %3459  ;;  %2503 = vmatprep.mubr.f32.mxu1 %v3458_v43 }
 0x1ae   : >> { %2504 = vmatmul.mubr.f32.gmra.mrb[2].mxu1 %v3460_v52 }
 0x1af   : >> { %3055 = vmatpush3.bf16.msra.mxu1 %v4131_v13 }
 0x1b0   : >> { %v3462_v53 = vpop.eup %3461  ;;  %3057 = vmatprep.subr.bf16.mxu1 %v4136_v16 }
 0x1b1   : >> { %v3464_v55 = vpop.eup %3463  ;;  %2506 = vmatprep.mubr.f32.mxu1 %v3462_v53 }
 0x1b2   : >> { %2507 = vmatmul.mubr.f32.gmra.mrb[4].mxu1 %v3464_v55 }
 0x1b3   : >> { %3059 = vmatpush3.bf16.msra.mxu1 %v4136_v16 }
 0x1b4   : >> { %v3466_v56 = vpop.eup %3465  ;;  %3061 = vmatprep.subr.bf16.mxu1 %v4143_v23 }
 0x1b5   : >> { %v3468_v58 = vpop.eup %3467  ;;  %2509 = vmatprep.mubr.f32.mxu1 %v3466_v56 }
 0x1b6   : >> { %2510 = vmatmul.mubr.f32.gmra.mrb[6].mxu1 %v3468_v58 }
 0x1b7   : >> { %3063 = vmatpush3.bf16.msra.mxu1 %v4143_v23 }
 0x1b8   : >> { %3065 = vmatprep.subr.bf16.mxu1 %v4153_v31 }
 0x1bb   : >> { %3067 = vmatpush3.bf16.msra.mxu1 %v4153_v31 }
 0x1bc   : >> { %3069 = vmatprep.subr.bf16.mxu1 %v4161_v37 }
 0x1bf   : >> { %3071 = vmatpush3.bf16.msra.mxu1 %v4161_v37 }
 0x1c0   : >> { %3073 = vmatprep.subr.bf16.mxu1 %v4169_v41 }
 0x1c3   : >> { %3075 = vmatpush3.bf16.msra.mxu1 %v4169_v41 }
 0x1c4   : >> { %3077 = vmatprep.subr.bf16.mxu1 %v4175_v44 }
 0x1c7   : >> { %3079 = vmatpush3.bf16.msra.mxu1 %v4175_v44 }
 0x1c8   : >> { %3113 = vmatprep.subr.bf16.mxu1 %v4218_v3 }
 0x27d   : >> { %v2502_v19 = vpop.f32.mrb[0].mxu1 }
 0x27e   : >> { %v646_v20 = vadd.f32 %v2502_v19, %v4283_v18  ;;  %v640_v21 = vpop.f32.mrb[1].mxu1 }
 0x27f   : >> { %v641_v22 = vadd.f32 %v4283_v18, %v640_v21 }
 0x281   : >> { %3469 = vtanh.f32 %v641_v22  ;;  %v2505_v24 = vpop.f32.mrb[2].mxu1 }
 0x282   : >> { %3471 = vtanh.f32 %v646_v20  ;;  %v656_v26 = vadd.f32 %v2505_v24, %v4283_v18  ;;  %v650_v27 = vpop.f32.mrb[3].mxu1 }
 0x283   : >> { %v651_v29 = vadd.f32 %v4283_v18, %v650_v27 }
 0x285   : >> { %3473 = vtanh.f32 %v651_v29  ;;  %v2508_v30 = vpop.f32.mrb[4].mxu1 }
 0x286   : >> { %3475 = vtanh.f32 %v656_v26  ;;  %v666_v32 = vadd.f32 %v2508_v30, %v4283_v18  ;;  %v660_v34 = vpop.f32.mrb[5].mxu1 }
 0x287   : >> { %v661_v35 = vadd.f32 %v4283_v18, %v660_v34 }
 0x289   : >> { %3477 = vtanh.f32 %v661_v35  ;;  %v2511_v36 = vpop.f32.mrb[6].mxu1 }
 0x28a   : >> { %3479 = vtanh.f32 %v666_v32  ;;  %v676_v39 = vadd.f32 %v2511_v36, %v4283_v18  ;;  %v670_v40 = vpop.f32.mrb[7].mxu1 }
 0x28b   : >> { %v3470_v42 = vpop.eup %3469  ;;  %v671_v43 = vadd.f32 %v4283_v18, %v670_v40 }
 0x28c   : >> { %v3472_v52 = vpop.eup %3471  ;;  %2544 = vmatprep.mubr.f32.mxu0 %v3470_v42 }
 0x28d   : >> { %3481 = vtanh.f32 %v671_v43  ;;  %2545 = vmatmul.mubr.f32.vlgmr.msra.gmra.mrb[8].mxu0 %v3472_v52 }
 0x28e   : >> { %3483 = vtanh.f32 %v676_v39  ;;  %3083 = vmatpush3.bf16.msra.mxu0 %v4145_v25 }
 0x28f   : >> { %v3474_v53 = vpop.eup %3473  ;;  %3085 = vmatprep.subr.bf16.mxu0 %v4147_v28 }
 0x290   : >> { %v3476_v55 = vpop.eup %3475  ;;  %2547 = vmatprep.mubr.f32.mxu0 %v3474_v53 }
 0x291   : >> { %2548 = vmatmul.mubr.f32.gmra.mrb[10].mxu0 %v3476_v55 }
 0x292   : >> { %3087 = vmatpush3.bf16.msra.mxu0 %v4147_v28 }
 0x293   : >> { %v3478_v56 = vpop.eup %3477  ;;  %3089 = vmatprep.subr.bf16.mxu0 %v4156_v33 }
 0x294   : >> { %v3480_v58 = vpop.eup %3479  ;;  %2550 = vmatprep.mubr.f32.mxu0 %v3478_v56 }
 0x295   : >> { %2551 = vmatmul.mubr.f32.gmra.mrb[12].mxu0 %v3480_v58 }
 0x296   : >> { %3091 = vmatpush3.bf16.msra.mxu0 %v4156_v33 }
 0x297   : >> { %v3482_v59 = vpop.eup %3481  ;;  %3093 = vmatprep.subr.bf16.mxu0 %v4164_v38 }
 0x298   : >> { %v3484_v61 = vpop.eup %3483  ;;  %2553 = vmatprep.mubr.f32.mxu0 %v3482_v59 }
 0x299   : >> { %2554 = vmatmul.mubr.f32.gmra.mrb[14].mxu0 %v3484_v61 }
 0x29a   : >> { %3095 = vmatpush3.bf16.msra.mxu0 %v4164_v38 }
 0x29b   : >> { %3097 = vmatprep.subr.bf16.mxu0 %v4201_v54 }
 0x29e   : >> { %3099 = vmatpush3.bf16.msra.mxu0 %v4201_v54 }
 0x29f   : >> { %3101 = vmatprep.subr.bf16.mxu0 %v4205_v57 }
 0x2a2   : >> { %3103 = vmatpush3.bf16.msra.mxu0 %v4205_v57 }
 0x2a3   : >> { %3105 = vmatprep.subr.bf16.mxu0 %v4209_v60 }
 0x2a6   : >> { %3107 = vmatpush3.bf16.msra.mxu0 %v4209_v60 }
 0x2a7   : >> { %3109 = vmatprep.subr.bf16.mxu0 %v4213_v63 }
 0x2aa   : >> { %3111 = vmatpush3.bf16.msra.mxu0 %v4213_v63 }
 0x2ab   : >> { %3145 = vmatprep.subr.bf16.mxu0 %v4129_v11 }
 0x360   : >> { %v2546_v1 = vpop.f32.mrb[8].mxu0 }
 0x361   : >> { %v4323_v6 = vadd.f32 %v2546_v1, %v4318_v0  ;;  %v776_v9 = vpop.f32.mrb[9].mxu0 }
 0x362   : >> { %v4326_v10 = vadd.f32 %v4318_v0, %v776_v9 }
 0x363   : >> { %v834_v19 = vmul.f32 %v4320_v4, %v4323_v6 }
 0x364   : >> { %v833_v20 = vmul.f32 %v4320_v4, %v4326_v10  ;;  %v2549_v21 = vpop.f32.mrb[10].mxu0 }
 0x365   : >> { %v4333_v22 = vadd.f32 %v2549_v21, %v4318_v0  ;;  %v786_v24 = vpop.f32.mrb[11].mxu0  ;;  %v842_v29 = vadd.f32 %v834_v19, %v4180_v45 }
 0x366   : >> { %v4336_v26 = vadd.f32 %v4318_v0, %v786_v24  ;;  %v841_v27 = vadd.f32 %v833_v20, %v4138_v17 }
 0x367   : >> { %v836_v30 = vmul.f32 %v4320_v4, %v4333_v22 }
 0x368   : >> { %v835_v32 = vmul.f32 %v4320_v4, %v4336_v26  ;;  %v2552_v34 = vpop.f32.mrb[12].mxu0  ;;  %2588 = vmatprep.mubr.f32.mxu1 %v841_v27 }
 0x369   : >> { %v4345_v35 = vadd.f32 %v2552_v34, %v4318_v0  ;;  %v796_v36 = vpop.f32.mrb[13].mxu0  ;;  %2589 = vmatmul.mubr.f32.vlgmr.msra.gmra.mrb[8].mxu1 %v842_v29  ;;  %v844_v43 = vadd.f32 %v836_v30, %v4186_v47 }
 0x36a   : >> { %v4348_v39 = vadd.f32 %v4318_v0, %v796_v36  ;;  %v843_v40 = vadd.f32 %v835_v32, %v4182_v46  ;;  %3115 = vmatpush3.bf16.msra.mxu1 %v4218_v3 }
 0x36b   : >> { %v838_v42 = vmul.f32 %v4320_v4, %v4345_v35  ;;  %3117 = vmatprep.subr.bf16.mxu1 %v4220_v5 }
 0x36c   : >> { %v837_v52 = vmul.f32 %v4320_v4, %v4348_v39  ;;  %v2555_v53 = vpop.f32.mrb[14].mxu0  ;;  %2591 = vmatprep.mubr.f32.mxu1 %v843_v40 }
 0x36d   : >> { %v4359_v55 = vadd.f32 %v2555_v53, %v4318_v0  ;;  %v806_v56 = vpop.f32.mrb[15].mxu0  ;;  %2592 = vmatmul.mubr.f32.gmra.mrb[10].mxu1 %v844_v43  ;;  %v846_v1 = vadd.f32 %v838_v42, %v4192_v49 }
 0x36e   : >> { %v4362_v58 = vadd.f32 %v4318_v0, %v806_v56  ;;  %v845_v59 = vadd.f32 %v837_v52, %v4188_v48  ;;  %3119 = vmatpush3.bf16.msra.mxu1 %v4220_v5 }
 0x36f   : >> { %v840_v61 = vmul.f32 %v4320_v4, %v4359_v55  ;;  %3121 = vmatprep.subr.bf16.mxu1 %v4225_v8 }
 0x370   : >> { %v839_v9 = vmul.f32 %v4320_v4, %v4362_v58  ;;  %2594 = vmatprep.mubr.f32.mxu1 %v845_v59 }
 0x371   : >> { %2595 = vmatmul.mubr.f32.gmra.mrb[12].mxu1 %v846_v1  ;;  %v848_v20 = vadd.f32 %v840_v61, %v4198_v51 }
 0x372   : >> { %v847_v19 = vadd.f32 %v839_v9, %v4194_v50  ;;  %3123 = vmatpush3.bf16.msra.mxu1 %v4225_v8 }
 0x373   : >> { %3125 = vmatprep.subr.bf16.mxu1 %v4229_v12 }
 0x374   : >> { %2597 = vmatprep.mubr.f32.mxu1 %v847_v19 }
 0x375   : >> { %2598 = vmatmul.mubr.f32.gmra.mrb[14].mxu1 %v848_v20 }
 0x376   : >> { %3127 = vmatpush3.bf16.msra.mxu1 %v4229_v12 }
 0x377   : >> { %3129 = vmatprep.subr.bf16.mxu1 %v4263_v62 }
 0x37a   : >> { %3131 = vmatpush3.bf16.msra.mxu1 %v4263_v62 }
 0x37b   : >> { %3133 = vmatprep.subr.bf16.mxu1 %v4267_v2 }
 0x37e   : >> { %3135 = vmatpush3.bf16.msra.mxu1 %v4267_v2 }
 0x37f   : >> { %3137 = vmatprep.subr.bf16.mxu1 %v4271_v7 }
 0x382   : >> { %3139 = vmatpush3.bf16.msra.mxu1 %v4271_v7 }
 0x383   : >> { %3141 = vmatprep.subr.bf16.mxu1 %v4275_v15 }
 0x386   : >> { %3143 = vmatpush3.bf16.msra.mxu1 %v4275_v15 }
 0x387   : >> { %3177 = vmatprep.subr.bf16.mxu1 %v4145_v25 }
 0x43c   : >> { %v2590_v21 = vpop.f32.mrb[8].mxu1 }
 0x43d   : >> { %v921_v24 = vadd.f32 %v2590_v21, %v4237_v14  ;;  %v915_v27 = vpop.f32.mrb[9].mxu1 }
 0x43e   : >> { %v916_v29 = vadd.f32 %v4237_v14, %v915_v27 }
 0x440   : >> { %3485 = vtanh.f32 %v916_v29  ;;  %v2593_v30 = vpop.f32.mrb[10].mxu1 }
 0x441   : >> { %3487 = vtanh.f32 %v921_v24  ;;  %v931_v32 = vadd.f32 %v2593_v30, %v4237_v14  ;;  %v925_v34 = vpop.f32.mrb[11].mxu1 }
 0x442   : >> { %v926_v36 = vadd.f32 %v4237_v14, %v925_v34 }
 0x444   : >> { %3489 = vtanh.f32 %v926_v36  ;;  %v2596_v40 = vpop.f32.mrb[12].mxu1 }
 0x445   : >> { %3491 = vtanh.f32 %v931_v32  ;;  %v941_v42 = vadd.f32 %v2596_v40, %v4237_v14  ;;  %v935_v43 = vpop.f32.mrb[13].mxu1 }
 0x446   : >> { %v936_v52 = vadd.f32 %v4237_v14, %v935_v43 }
 0x448   : >> { %3493 = vtanh.f32 %v936_v52  ;;  %v2599_v53 = vpop.f32.mrb[14].mxu1 }
 0x449   : >> { %3495 = vtanh.f32 %v941_v42  ;;  %v951_v56 = vadd.f32 %v2599_v53, %v4237_v14  ;;  %v945_v59 = vpop.f32.mrb[15].mxu1 }
 0x44a   : >> { %v3486_v61 = vpop.eup %3485  ;;  %v946_v1 = vadd.f32 %v4237_v14, %v945_v59 }
 0x44b   : >> { %v3488_v9 = vpop.eup %3487  ;;  %2632 = vmatprep.mubr.f32.mxu0 %v3486_v61 }
 0x44c   : >> { %3497 = vtanh.f32 %v946_v1  ;;  %2633 = vmatmul.mubr.f32.vlgmr.msra.gmra.mrb[16].mxu0 %v3488_v9 }
 0x44d   : >> { %3499 = vtanh.f32 %v951_v56  ;;  %3147 = vmatpush3.bf16.msra.mxu0 %v4129_v11 }
 0x44e   : >> { %v3490_v19 = vpop.eup %3489  ;;  %3149 = vmatprep.subr.bf16.mxu0 %v4131_v13 }
 0x44f   : >> { %v3492_v20 = vpop.eup %3491  ;;  %2635 = vmatprep.mubr.f32.mxu0 %v3490_v19 }
 0x450   : >> { %2636 = vmatmul.mubr.f32.gmra.mrb[18].mxu0 %v3492_v20 }
 0x451   : >> { %3151 = vmatpush3.bf16.msra.mxu0 %v4131_v13 }
 0x452   : >> { %v3494_v21 = vpop.eup %3493  ;;  %3153 = vmatprep.subr.bf16.mxu0 %v4136_v16 }
 0x453   : >> { %v3496_v24 = vpop.eup %3495  ;;  %2638 = vmatprep.mubr.f32.mxu0 %v3494_v21 }
 0x454   : >> { %2639 = vmatmul.mubr.f32.gmra.mrb[20].mxu0 %v3496_v24 }
 0x455   : >> { %3155 = vmatpush3.bf16.msra.mxu0 %v4136_v16 }
 0x456   : >> { %v3498_v27 = vpop.eup %3497  ;;  %3157 = vmatprep.subr.bf16.mxu0 %v4143_v23 }
 0x457   : >> { %v3500_v29 = vpop.eup %3499  ;;  %2641 = vmatprep.mubr.f32.mxu0 %v3498_v27 }
 0x458   : >> { %2642 = vmatmul.mubr.f32.gmra.mrb[22].mxu0 %v3500_v29 }
 0x459   : >> { %3159 = vmatpush3.bf16.msra.mxu0 %v4143_v23 }
 0x45a   : >> { %3161 = vmatprep.subr.bf16.mxu0 %v4153_v31 }
 0x45d   : >> { %3163 = vmatpush3.bf16.msra.mxu0 %v4153_v31 }
 0x45e   : >> { %3165 = vmatprep.subr.bf16.mxu0 %v4161_v37 }
 0x461   : >> { %3167 = vmatpush3.bf16.msra.mxu0 %v4161_v37 }
 0x462   : >> { %3169 = vmatprep.subr.bf16.mxu0 %v4169_v41 }
 0x465   : >> { %3171 = vmatpush3.bf16.msra.mxu0 %v4169_v41 }
 0x466   : >> { %3173 = vmatprep.subr.bf16.mxu0 %v4175_v44 }
 0x469   : >> { %3175 = vmatpush3.bf16.msra.mxu0 %v4175_v44 }
 0x46a   : >> { %3209 = vmatprep.subr.bf16.mxu0 %v4218_v3 }
 0x51f   : >> { %v2634_v30 = vpop.f32.mrb[16].mxu0 }
 0x520   : >> { %v1034_v32 = vadd.f32 %v2634_v30, %v4283_v18  ;;  %v1028_v34 = vpop.f32.mrb[17].mxu0 }
 0x521   : >> { %v1029_v36 = vadd.f32 %v4283_v18, %v1028_v34 }
 0x523   : >> { %3501 = vtanh.f32 %v1029_v36  ;;  %v2637_v40 = vpop.f32.mrb[18].mxu0 }
 0x524   : >> { %3503 = vtanh.f32 %v1034_v32  ;;  %v1044_v42 = vadd.f32 %v2637_v40, %v4283_v18  ;;  %v1038_v43 = vpop.f32.mrb[19].mxu0  ;;  %v4435_v40 = vstv %s405_s23 }
 0x525   : >> { %v1039_v52 = vadd.f32 %v4283_v18, %v1038_v43  ;;  %v816_v43 = vmul.f32 %v4435_v40, %v4326_v10  ;;  %v818_v10 = vmul.f32 %v4435_v40, %v4336_v26 }
 0x527   : >> { %3505 = vtanh.f32 %v1039_v52  ;;  %v2640_v53 = vpop.f32.mrb[20].mxu0 }
 0x528   : >> { %3507 = vtanh.f32 %v1044_v42  ;;  %v1054_v56 = vadd.f32 %v2640_v53, %v4283_v18  ;;  %v1048_v59 = vpop.f32.mrb[21].mxu0  ;;  %v817_v42 = vmul.f32 %v4435_v40, %v4323_v6  ;;  %v4442_v53 = vstv %s406_s10 }
 0x529   : >> { %v1049_v61 = vadd.f32 %v4283_v18, %v1048_v59 }
 0x52b   : >> { %3509 = vtanh.f32 %v1049_v61  ;;  %v2643_v1 = vpop.f32.mrb[22].mxu0 }
 0x52c   : >> { %3511 = vtanh.f32 %v1054_v56  ;;  %v1064_v9 = vadd.f32 %v2643_v1, %v4283_v18  ;;  %v1058_v19 = vpop.f32.mrb[23].mxu0  ;;  %v825_v1 = vadd.f32 %v817_v42, %v4180_v45 }
 0x52d   : >> { %v3502_v20 = vpop.eup %3501  ;;  %v1059_v21 = vadd.f32 %v4283_v18, %v1058_v19 }
 0x52e   : >> { %v3504_v24 = vpop.eup %3503  ;;  %2676 = vmatprep.mubr.f32.mxu1 %v3502_v20  ;;  %v824_v20 = vadd.f32 %v816_v43, %v4138_v17 }
 0x52f   : >> { %3513 = vtanh.f32 %v1059_v21  ;;  %2677 = vmatmul.mubr.f32.vlgmr.msra.gmra.mrb[16].mxu1 %v3504_v24 }
 0x530   : >> { %3515 = vtanh.f32 %v1064_v9  ;;  %3179 = vmatpush3.bf16.msra.mxu1 %v4145_v25  ;;  %v819_v9 = vmul.f32 %v4435_v40, %v4333_v22  ;;  %v821_v22 = vmul.f32 %v4435_v40, %v4345_v35 }
 0x531   : >> { %v3506_v27 = vpop.eup %3505  ;;  %3181 = vmatprep.subr.bf16.mxu1 %v4147_v28 }
 0x532   : >> { %v3508_v29 = vpop.eup %3507  ;;  %2679 = vmatprep.mubr.f32.mxu1 %v3506_v27  ;;  %v827_v26 = vadd.f32 %v819_v9, %v4186_v47 }
 0x533   : >> { %2680 = vmatmul.mubr.f32.gmra.mrb[18].mxu1 %v3508_v29 }
 0x534   : >> { %3183 = vmatpush3.bf16.msra.mxu1 %v4147_v28 }
 0x535   : >> { %v3510_v30 = vpop.eup %3509  ;;  %3185 = vmatprep.subr.bf16.mxu1 %v4156_v33 }
 0x536   : >> { %v3512_v32 = vpop.eup %3511  ;;  %2682 = vmatprep.mubr.f32.mxu1 %v3510_v30 }
 0x537   : >> { %2683 = vmatmul.mubr.f32.gmra.mrb[20].mxu1 %v3512_v32 }
 0x538   : >> { %3187 = vmatpush3.bf16.msra.mxu1 %v4156_v33 }
 0x539   : >> { %v3514_v34 = vpop.eup %3513  ;;  %3189 = vmatprep.subr.bf16.mxu1 %v4164_v38 }
 0x53a   : >> { %v3516_v36 = vpop.eup %3515  ;;  %2685 = vmatprep.mubr.f32.mxu1 %v3514_v34 }
 0x53b   : >> { %2686 = vmatmul.mubr.f32.gmra.mrb[22].mxu1 %v3516_v36 }
 0x53c   : >> { %3191 = vmatpush3.bf16.msra.mxu1 %v4164_v38 }
 0x53d   : >> { %3193 = vmatprep.subr.bf16.mxu1 %v4201_v54 }
 0x540   : >> { %3195 = vmatpush3.bf16.msra.mxu1 %v4201_v54 }
 0x541   : >> { %3197 = vmatprep.subr.bf16.mxu1 %v4205_v57 }
 0x544   : >> { %3199 = vmatpush3.bf16.msra.mxu1 %v4205_v57 }
 0x545   : >> { %3201 = vmatprep.subr.bf16.mxu1 %v4209_v60 }
 0x548   : >> { %3203 = vmatpush3.bf16.msra.mxu1 %v4209_v60 }
 0x549   : >> { %3205 = vmatprep.subr.bf16.mxu1 %v4213_v63 }
 0x54c   : >> { %3207 = vmatpush3.bf16.msra.mxu1 %v4213_v63 }
 0x54d   : >> { %3241 = vmatprep.subr.bf16.mxu1 %v4129_v11 }
 0x602   : >> { %v2678_v52 = vpop.f32.mrb[16].mxu1 }
 0x603   : >> { %v1147_v56 = vadd.f32 %v2678_v52, %v4318_v0  ;;  %v1141_v59 = vpop.f32.mrb[17].mxu1 }
 0x604   : >> { %v1142_v61 = vadd.f32 %v4318_v0, %v1141_v59  ;;  %v826_v59 = vadd.f32 %v818_v10, %v4182_v46 }
 0x605   : >> { %v1182_v19 = vmul.f32 %v4442_v53, %v1147_v56  ;;  %v1198_v6 = vmul.f32 %v1147_v56, %v4320_v4 }
 0x606   : >> { %v1181_v21 = vmul.f32 %v4442_v53, %v1142_v61  ;;  %v1197_v24 = vmul.f32 %v1142_v61, %v4320_v4  ;;  %v2681_v27 = vpop.f32.mrb[18].mxu1  ;;  %v820_v61 = vmul.f32 %v4435_v40, %v4348_v39 }
 0x607   : >> { %v4456_v29 = vadd.f32 %v1182_v19, %v825_v1  ;;  %v1157_v30 = vadd.f32 %v2681_v27, %v4318_v0  ;;  %v1151_v32 = vpop.f32.mrb[19].mxu1  ;;  %v1206_v43 = vadd.f32 %v1198_v6, %v4180_v45  ;;  %v829_v6 = vadd.f32 %v821_v22, %v4192_v49 }
 0x608   : >> { %v4461_v34 = vadd.f32 %v1181_v21, %v824_v20  ;;  %v1152_v36 = vadd.f32 %v4318_v0, %v1151_v32  ;;  %v1205_v42 = vadd.f32 %v1197_v24, %v4138_v17  ;;  %v823_v21 = vmul.f32 %v4435_v40, %v4359_v55 }
 0x609   : >> { %v1184_v52 = vmul.f32 %v4442_v53, %v1157_v30  ;;  %v1200_v56 = vmul.f32 %v1157_v30, %v4320_v4  ;;  %v828_v32 = vadd.f32 %v820_v61, %v4188_v48  ;;  %v822_v22 = vmul.f32 %v4435_v40, %v4362_v58 }
 0x60a   : >> { %v1183_v35 = vmul.f32 %v4442_v53, %v1152_v36  ;;  %v1199_v1 = vmul.f32 %v1152_v36, %v4320_v4  ;;  %v2684_v19 = vpop.f32.mrb[20].mxu1  ;;  %2720 = vmatprep.mubr.f32.mxu0 %v1205_v42  ;;  %v831_v58 = vadd.f32 %v823_v21, %v4198_v51 }
 0x60b   : >> { %v4474_v17 = vadd.f32 %v1184_v52, %v827_v26  ;;  %v1167_v9 = vadd.f32 %v2684_v19, %v4318_v0  ;;  %v1161_v45 = vpop.f32.mrb[21].mxu1  ;;  %2721 = vmatmul.mubr.f32.vlgmr.msra.gmra.mrb[24].mxu0 %v1206_v43  ;;  %v1208_v30 = vadd.f32 %v1200_v56, %v4186_v47 }
 0x60c   : >> { %v4478_v20 = vadd.f32 %v1183_v35, %v826_v59  ;;  %v1162_v10 = vadd.f32 %v4318_v0, %v1161_v45  ;;  %v1207_v39 = vadd.f32 %v1199_v1, %v4182_v46  ;;  %3211 = vmatpush3.bf16.msra.mxu0 %v4218_v3  ;;  %v830_v1 = vadd.f32 %v822_v22, %v4194_v50 }
 0x60d   : >> { %v1186_v24 = vmul.f32 %v4442_v53, %v1167_v9  ;;  %v1202_v27 = vmul.f32 %v1167_v9, %v4320_v4  ;;  %3213 = vmatprep.subr.bf16.mxu0 %v4220_v5 }
 0x60e   : >> { %v1185_v46 = vmul.f32 %v4442_v53, %v1162_v10  ;;  %v1201_v36 = vmul.f32 %v1162_v10, %v4320_v4  ;;  %v2687_v42 = vpop.f32.mrb[22].mxu1  ;;  %2723 = vmatprep.mubr.f32.mxu0 %v1207_v39 }
 0x60f   : >> { %v4494_v55 = vadd.f32 %v1186_v24, %v829_v6  ;;  %v1177_v26 = vadd.f32 %v2687_v42, %v4318_v0  ;;  %v1171_v43 = vpop.f32.mrb[23].mxu1  ;;  %2724 = vmatmul.mubr.f32.gmra.mrb[26].mxu0 %v1208_v30  ;;  %v1210_v35 = vadd.f32 %v1202_v27, %v4192_v49 }
 0x610   : >> { %v4497_v47 = vadd.f32 %v1185_v46, %v828_v32  ;;  %v1172_v52 = vadd.f32 %v4318_v0, %v1171_v43  ;;  %v1209_v56 = vadd.f32 %v1201_v36, %v4188_v48  ;;  %3215 = vmatpush3.bf16.msra.mxu0 %v4220_v5 }
 0x611   : >> { %v1188_v59 = vmul.f32 %v4442_v53, %v1177_v26  ;;  %v1204_v61 = vmul.f32 %v1177_v26, %v4320_v4  ;;  %3217 = vmatprep.subr.bf16.mxu0 %v4225_v8 }
 0x612   : >> { %v1187_v19 = vmul.f32 %v4442_v53, %v1172_v52  ;;  %v1203_v9 = vmul.f32 %v1172_v52, %v4320_v4  ;;  %2726 = vmatprep.mubr.f32.mxu0 %v1209_v56 }
 0x613   : >> { %v4510_v48 = vadd.f32 %v1188_v59, %v831_v58  ;;  %2727 = vmatmul.mubr.f32.gmra.mrb[28].mxu0 %v1210_v35  ;;  %v1212_v49 = vadd.f32 %v1204_v61, %v4198_v51 }
 0x614   : >> { %v4512_v45 = vadd.f32 %v1187_v19, %v830_v1  ;;  %v1211_v6 = vadd.f32 %v1203_v9, %v4194_v50  ;;  %3219 = vmatpush3.bf16.msra.mxu0 %v4225_v8 }
 0x615   : >> { %3221 = vmatprep.subr.bf16.mxu0 %v4229_v12 }
 0x616   : >> { %2729 = vmatprep.mubr.f32.mxu0 %v1211_v6 }
 0x617   : >> { %2730 = vmatmul.mubr.f32.gmra.mrb[30].mxu0 %v1212_v49 }
 0x618   : >> { %3223 = vmatpush3.bf16.msra.mxu0 %v4229_v12 }
 0x619   : >> { %3225 = vmatprep.subr.bf16.mxu0 %v4263_v62 }
 0x61c   : >> { %3227 = vmatpush3.bf16.msra.mxu0 %v4263_v62 }
 0x61d   : >> { %3229 = vmatprep.subr.bf16.mxu0 %v4267_v2 }
 0x620   : >> { %3231 = vmatpush3.bf16.msra.mxu0 %v4267_v2 }
 0x621   : >> { %3233 = vmatprep.subr.bf16.mxu0 %v4271_v7 }
 0x624   : >> { %3235 = vmatpush3.bf16.msra.mxu0 %v4271_v7 }
 0x625   : >> { %3237 = vmatprep.subr.bf16.mxu0 %v4275_v15 }
 0x628   : >> { %3239 = vmatpush3.bf16.msra.mxu0 %v4275_v15 }
 0x629   : >> { %3273 = vmatprep.subr.bf16.mxu0 %v4145_v25 }
 0x6de   : >> { %v2722_v50 = vpop.f32.mrb[24].mxu0 }
 0x6df   : >> { %v1285_v51 = vadd.f32 %v2722_v50, %v4237_v14  ;;  %v1279_v4 = vpop.f32.mrb[25].mxu0 }
 0x6e0   : >> { %v1280_v10 = vadd.f32 %v4237_v14, %v1279_v4 }
 0x6e2   : >> { %3517 = vtanh.f32 %v1280_v10  ;;  %v2725_v39 = vpop.f32.mrb[26].mxu0 }
 0x6e3   : >> { %3519 = vtanh.f32 %v1285_v51  ;;  %v1295_v21 = vadd.f32 %v2725_v39, %v4237_v14  ;;  %v1289_v24 = vpop.f32.mrb[27].mxu0 }
 0x6e4   : >> { %v1290_v27 = vadd.f32 %v4237_v14, %v1289_v24 }
 0x6e6   : >> { %3521 = vtanh.f32 %v1290_v27  ;;  %v2728_v30 = vpop.f32.mrb[28].mxu0 }
 0x6e7   : >> { %3523 = vtanh.f32 %v1295_v21  ;;  %v1305_v32 = vadd.f32 %v2728_v30, %v4237_v14  ;;  %v1299_v22 = vpop.f32.mrb[29].mxu0 }
 0x6e8   : >> { %v1300_v46 = vadd.f32 %v4237_v14, %v1299_v22 }
 0x6ea   : >> { %3525 = vtanh.f32 %v1300_v46  ;;  %v2731_v36 = vpop.f32.mrb[30].mxu0 }
 0x6eb   : >> { %3527 = vtanh.f32 %v1305_v32  ;;  %v1315_v42 = vadd.f32 %v2731_v36, %v4237_v14  ;;  %v1309_v26 = vpop.f32.mrb[31].mxu0 }
 0x6ec   : >> { %v3518_v43 = vpop.eup %3517  ;;  %v1310_v52 = vadd.f32 %v4237_v14, %v1309_v26 }
 0x6ed   : >> { %v3520_v56 = vpop.eup %3519  ;;  %2764 = vmatprep.mubr.f32.mxu1 %v3518_v43 }
 0x6ee   : >> { %3529 = vtanh.f32 %v1310_v52  ;;  %2765 = vmatmul.mubr.f32.vlgmr.msra.gmra.mrb[24].mxu1 %v3520_v56 }
 0x6ef   : >> { %3531 = vtanh.f32 %v1315_v42  ;;  %3243 = vmatpush3.bf16.msra.mxu1 %v4129_v11 }
 0x6f0   : >> { %v3522_v58 = vpop.eup %3521  ;;  %3245 = vmatprep.subr.bf16.mxu1 %v4131_v13 }
 0x6f1   : >> { %v3524_v59 = vpop.eup %3523  ;;  %2767 = vmatprep.mubr.f32.mxu1 %v3522_v58  ;;  %v3581_v58 = vld [vmem:[#allocation2] sm:$0xff] }
 0x6f2   : >> { %2768 = vmatmul.mubr.f32.gmra.mrb[26].mxu1 %v3524_v59 }
 0x6f3   : >> { %3247 = vmatpush3.bf16.msra.mxu1 %v4131_v13 }
 0x6f4   : >> { %v3526_v61 = vpop.eup %3525  ;;  %3249 = vmatprep.subr.bf16.mxu1 %v4136_v16 }
 0x6f5   : >> { %v3528_v35 = vpop.eup %3527  ;;  %2770 = vmatprep.mubr.f32.mxu1 %v3526_v61  ;;  %v3582_v61 = vld [vmem:[#allocation2 + $0x8] sm:$0xff] }
 0x6f6   : >> { %2771 = vmatmul.mubr.f32.gmra.mrb[28].mxu1 %v3528_v35 }
 0x6f7   : >> { %3251 = vmatpush3.bf16.msra.mxu1 %v4136_v16 }
 0x6f8   : >> { %v3530_v14 = vpop.eup %3529  ;;  %3253 = vmatprep.subr.bf16.mxu1 %v4143_v23 }
 0x6f9   : >> { %v3532_v11 = vpop.eup %3531  ;;  %2773 = vmatprep.mubr.f32.mxu1 %v3530_v14 }
 0x6fa   : >> { %2774 = vmatmul.mubr.f32.gmra.mrb[30].mxu1 %v3532_v11 }
 0x6fb   : >> { %3255 = vmatpush3.bf16.msra.mxu1 %v4143_v23 }
 0x6fc   : >> { %3257 = vmatprep.subr.bf16.mxu1 %v4153_v31 }
 0x6ff   : >> { %3259 = vmatpush3.bf16.msra.mxu1 %v4153_v31 }
 0x700   : >> { %3261 = vmatprep.subr.bf16.mxu1 %v4161_v37 }
 0x703   : >> { %3263 = vmatpush3.bf16.msra.mxu1 %v4161_v37 }
 0x704   : >> { %3265 = vmatprep.subr.bf16.mxu1 %v4169_v41 }
 0x707   : >> { %3267 = vmatpush3.bf16.msra.mxu1 %v4169_v41 }
 0x708   : >> { %3269 = vmatprep.subr.bf16.mxu1 %v4175_v44 }
 0x70b   : >> { %3271 = vmatpush3.bf16.msra.mxu1 %v4175_v44 }
 0x70c   : >> { %3305 = vmatprep.subr.bf16.mxu1 %v4218_v3 }
 0x7c1   : >> { %v2766_v13 = vpop.f32.mrb[24].mxu1 }
 0x7c2   : >> { %v1398_v16 = vadd.f32 %v2766_v13, %v4283_v18  ;;  %v1392_v23 = vpop.f32.mrb[25].mxu1 }
 0x7c3   : >> { %v1393_v31 = vadd.f32 %v4283_v18, %v1392_v23 }
 0x7c5   : >> { %3533 = vtanh.f32 %v1393_v31  ;;  %v2769_v1 = vpop.f32.mrb[26].mxu1 }
 0x7c6   : >> { %3535 = vtanh.f32 %v1398_v16  ;;  %v1408_v37 = vadd.f32 %v2769_v1, %v4283_v18  ;;  %v1402_v19 = vpop.f32.mrb[27].mxu1 }
 0x7c7   : >> { %v1403_v41 = vadd.f32 %v4283_v18, %v1402_v19  ;;  %v3583_v19 = vld [vmem:[#allocation2 + $0x10] sm:$0xff] }
 0x7c9   : >> { %3537 = vtanh.f32 %v1403_v41  ;;  %v2772_v9 = vpop.f32.mrb[28].mxu1 }
 0x7ca   : >> { %3539 = vtanh.f32 %v1408_v37  ;;  %v1418_v44 = vadd.f32 %v2772_v9, %v4283_v18  ;;  %v1412_v6 = vpop.f32.mrb[29].mxu1 }
 0x7cb   : >> { %v1413_v49 = vadd.f32 %v4283_v18, %v1412_v6  ;;  %v3584_v6 = vld [vmem:[#allocation2 + $0x18] sm:$0xff] }
 0x7cd   : >> { %3541 = vtanh.f32 %v1413_v49  ;;  %v2775_v50 = vpop.f32.mrb[30].mxu1 }
 0x7ce   : >> { %3543 = vtanh.f32 %v1418_v44  ;;  %v1428_v51 = vadd.f32 %v2775_v50, %v4283_v18  ;;  %v1422_v4 = vpop.f32.mrb[31].mxu1 }
 0x7cf   : >> { %v3534_v10 = vpop.eup %3533  ;;  %v1423_v39 = vadd.f32 %v4283_v18, %v1422_v4 }
 0x7d0   : >> { %v3536_v21 = vpop.eup %3535  ;;  %2808 = vmatprep.mubr.f32.mxu0 %v3534_v10 }
 0x7d1   : >> { %3545 = vtanh.f32 %v1423_v39  ;;  %2809 = vmatmul.mubr.f32.vlgmr.msra.gmra.mrb[32].mxu0 %v3536_v21  ;;  %v3585_v21 = vld [vmem:[#allocation2 + $0x20] sm:$0xff] }
 0x7d2   : >> { %3547 = vtanh.f32 %v1428_v51  ;;  %3275 = vmatpush3.bf16.msra.mxu0 %v4145_v25 }
 0x7d3   : >> { %v3538_v24 = vpop.eup %3537  ;;  %3277 = vmatprep.subr.bf16.mxu0 %v4147_v28 }
 0x7d4   : >> { %v3540_v27 = vpop.eup %3539  ;;  %2811 = vmatprep.mubr.f32.mxu0 %v3538_v24 }
 0x7d5   : >> { %2812 = vmatmul.mubr.f32.gmra.mrb[34].mxu0 %v3540_v27 }
 0x7d6   : >> { %3279 = vmatpush3.bf16.msra.mxu0 %v4147_v28 }
 0x7d7   : >> { %v3542_v30 = vpop.eup %3541  ;;  %3281 = vmatprep.subr.bf16.mxu0 %v4156_v33 }
 0x7d8   : >> { %v3544_v32 = vpop.eup %3543  ;;  %2814 = vmatprep.mubr.f32.mxu0 %v3542_v30 }
 0x7d9   : >> { %2815 = vmatmul.mubr.f32.gmra.mrb[36].mxu0 %v3544_v32  ;;  %v3586_v32 = vld [vmem:[#allocation2 + $0x28] sm:$0xff] }
 0x7da   : >> { %3283 = vmatpush3.bf16.msra.mxu0 %v4156_v33  ;;  %v1560_v33 = vstv %s4312_s20  ;;  %s2128_s20 = sshll.u32 %s3800_s11, 6  ;;  %s394_s11 = sadd.s32 1, %s3800_s11  }
 0x7db   : >> { %v3546_v18 = vpop.eup %3545  ;;  %3285 = vmatprep.subr.bf16.mxu0 %v4164_v38  ;;  %s4643_s28 = scalar_lea.vmem %s4122_s30, %s2128_s20 [#allocation14]  ;;  %p391_p0 = scmp.ge.s32.totalorder %s394_s11, 8  }
 0x7dc   : >> { %v3548_v25 = vpop.eup %3547  ;;  %2817 = vmatprep.mubr.f32.mxu0 %v3546_v18  ;;  %s1943_s17 = scalar_lea.sflag (%p391_p0), [#allocation8], %s4102_s14 }
 0x7dd   : >> { %2818 = vmatmul.mubr.f32.gmra.mrb[38].mxu0 %v3548_v25 }
 0x7de   : >> { %3287 = vmatpush3.bf16.msra.mxu0 %v4164_v38 }
 0x7df   : >> { %3289 = vmatprep.subr.bf16.mxu0 %v4201_v54 }
 0x7e2   : >> { %3291 = vmatpush3.bf16.msra.mxu0 %v4201_v54 }
 0x7e3   : >> { %3293 = vmatprep.subr.bf16.mxu0 %v4205_v57 }
 0x7e6   : >> { %3295 = vmatpush3.bf16.msra.mxu0 %v4205_v57 }
 0x7e7   : >> { %3297 = vmatprep.subr.bf16.mxu0 %v4209_v60 }
 0x7ea   : >> { %3299 = vmatpush3.bf16.msra.mxu0 %v4209_v60 }
 0x7eb   : >> { %3301 = vmatprep.subr.bf16.mxu0 %v4213_v63 }
 0x7ee   : >> { %3303 = vmatpush3.bf16.msra.mxu0 %v4213_v63 }
 0x8a4   : >> { %v2810_v28 = vpop.f32.mrb[32].mxu0 }
 0x8a5   : >> { %v1511_v38 = vadd.f32 %v2810_v28, %v4318_v0  ;;  %v1505_v22 = vpop.f32.mrb[33].mxu0  ;;  %v3587_v28 = vld [vmem:[#allocation2 + $0x30] sm:$0xff] }
 0x8a6   : >> { %v1506_v46 = vadd.f32 %v4318_v0, %v1505_v22 }
 0x8a7   : >> { %v1545_v54 = vmul.f32 %v1511_v38, %v4442_v53  ;;  %v1562_v36 = vmul.f32 %v1560_v33, %v1511_v38  ;;  %v3588_v38 = vld [vmem:[#allocation2 + $0x38] sm:$0xff] }
 0x8a8   : >> { %v1544_v57 = vmul.f32 %v1506_v46, %v4442_v53  ;;  %v1561_v42 = vmul.f32 %v1560_v33, %v1506_v46  ;;  %v2813_v26 = vpop.f32.mrb[34].mxu0 }
 0x8a9   : >> { %v4581_v60 = vadd.f32 %v1545_v54, %v4456_v29  ;;  %v1521_v43 = vadd.f32 %v2813_v26, %v4318_v0  ;;  %v1515_v63 = vpop.f32.mrb[35].mxu0  ;;  %v1570_v35 = vadd.f32 %v3582_v61, %v1562_v36 }
 0x8aa   : >> { %v4585_v52 = vadd.f32 %v1544_v57, %v4461_v34  ;;  %v1516_v56 = vadd.f32 %v4318_v0, %v1515_v63  ;;  %v1569_v59 = vadd.f32 %v3581_v58, %v1561_v42 }
 0x8ab   : >> { %v1547_v14 = vmul.f32 %v1521_v43, %v4442_v53  ;;  %v1564_v11 = vmul.f32 %v1560_v33, %v1521_v43 }
 0x8ac   : >> { %v1546_v13 = vmul.f32 %v1516_v56, %v4442_v53  ;;  %v1563_v16 = vmul.f32 %v1560_v33, %v1516_v56  ;;  %v2816_v29 = vpop.f32.mrb[36].mxu0  ;;  %2852 = vmatprep.mubr.f32.mxu1 %v1569_v59 }
 0x8ad   : >> { %v4591_v23 = vadd.f32 %v1547_v14, %v4474_v17  ;;  %v1531_v34 = vadd.f32 %v2816_v29, %v4318_v0  ;;  %v1525_v31 = vpop.f32.mrb[37].mxu0  ;;  %2853 = vmatmul.mubr.f32.vlgmr.msra.gmra.mrb[32].mxu1 %v1570_v35  ;;  %v1572_v49 = vadd.f32 %v3584_v6, %v1564_v11 }
 0x8ae   : >> { %v4595_v1 = vadd.f32 %v1546_v13, %v4478_v20  ;;  %v1526_v37 = vadd.f32 %v4318_v0, %v1525_v31  ;;  %v1571_v41 = vadd.f32 %v3583_v19, %v1563_v16  ;;  %3307 = vmatpush3.bf16.msra.mxu1 %v4218_v3  ;;  %v3590_v16 = vld [vmem:[%s4719_s6] ss:$0 sm:$0xff] }
 0x8af   : >> { %v1549_v9 = vmul.f32 %v1531_v34, %v4442_v53  ;;  %v1566_v44 = vmul.f32 %v1560_v33, %v1531_v34  ;;  %3309 = vmatprep.subr.bf16.mxu1 %v4220_v5 }
 0x8b0   : >> { %v1548_v17 = vmul.f32 %v1526_v37, %v4442_v53  ;;  %v1565_v50 = vmul.f32 %v1560_v33, %v1526_v37  ;;  %v2819_v51 = vpop.f32.mrb[38].mxu0  ;;  %2855 = vmatprep.mubr.f32.mxu1 %v1571_v41 }
 0x8b1   : >> { %v4603_v20 = vadd.f32 %v1549_v9, %v4494_v55  ;;  %v1541_v4 = vadd.f32 %v2819_v51, %v4318_v0  ;;  %v1535_v10 = vpop.f32.mrb[39].mxu0  ;;  %2856 = vmatmul.mubr.f32.gmra.mrb[34].mxu1 %v1572_v49  ;;  %v1574_v18 = vadd.f32 %v3586_v32, %v1566_v44 }
 0x8b2   : >> { %v4607_v3 = vadd.f32 %v1548_v17, %v4497_v47  ;;  %v1536_v39 = vadd.f32 %v4318_v0, %v1535_v10  ;;  %v1573_v24 = vadd.f32 %v3585_v21, %v1565_v50  ;;  %3311 = vmatpush3.bf16.msra.mxu1 %v4220_v5 }
 0x8b3   : >> { %v1551_v27 = vmul.f32 %v1541_v4, %v4442_v53  ;;  %v1568_v30 = vmul.f32 %v1560_v33, %v1541_v4  ;;  %3313 = vmatprep.subr.bf16.mxu1 %v4225_v8 }
 0x8b4   : >> { %v1550_v55 = vmul.f32 %v1536_v39, %v4442_v53  ;;  %v1567_v25 = vmul.f32 %v1560_v33, %v1536_v39  ;;  %2858 = vmatprep.mubr.f32.mxu1 %v1573_v24 }
 0x8b5   : >> { %v4615_v47 = vadd.f32 %v1551_v27, %v4510_v48  ;;  %2859 = vmatmul.mubr.f32.gmra.mrb[36].mxu1 %v1574_v18  ;;  %v1576_v22 = vadd.f32 %v3588_v38, %v1568_v30 }
 0x8b6   : >> { %v4618_v0 = vadd.f32 %v1550_v55, %v4512_v45  ;;  %v1575_v5 = vadd.f32 %v3587_v28, %v1567_v25  ;;  %3315 = vmatpush3.bf16.msra.mxu1 %v4225_v8  ;;  %v3591_v28 = vld [vmem:[%s4748_s13] ss:$0 sm:$0xff] }
 0x8b7   : >> { %3317 = vmatprep.subr.bf16.mxu1 %v4229_v12 }
 0x8b8   : >> { %2861 = vmatprep.mubr.f32.mxu1 %v1575_v5 }
 0x8b9   : >> { %2862 = vmatmul.mubr.f32.gmra.mrb[38].mxu1 %v1576_v22 }
 0x8ba   : >> { %3319 = vmatpush3.bf16.msra.mxu1 %v4229_v12  ;;  %v3589_v12 = vld [vmem:[%s4717_s4] ss:$0 sm:$0xff] }
 0x8bb   : >> { %3321 = vmatprep.subr.bf16.mxu1 %v4263_v62 }
 0x8be   : >> { %3323 = vmatpush3.bf16.msra.mxu1 %v4263_v62 }
 0x8bf   : >> { %3325 = vmatprep.subr.bf16.mxu1 %v4267_v2 }
 0x8c2   : >> { %3327 = vmatpush3.bf16.msra.mxu1 %v4267_v2 }
 0x8c3   : >> { %3329 = vmatprep.subr.bf16.mxu1 %v4271_v7 }
 0x8c6   : >> { %3331 = vmatpush3.bf16.msra.mxu1 %v4271_v7 }
 0x8c7   : >> { %3333 = vmatprep.subr.bf16.mxu1 %v4275_v15 }
 0x8ca   : >> { %3335 = vmatpush3.bf16.msra.mxu1 %v4275_v15 }
 0x980   : >> { %v2854_v8 = vpop.f32.mrb[32].mxu1 }
 0x981   : >> { %v1649_v53 = vadd.f32 %v3589_v12, %v2854_v8  ;;  %v1643_v48 = vpop.f32.mrb[33].mxu1 }
 0x982   : >> { %v1644_v62 = vadd.f32 %v3589_v12, %v1643_v48 }
 0x984   : >> { %3549 = vtanh.f32 %v1644_v62  ;;  %v2857_v45 = vpop.f32.mrb[34].mxu1 }
 0x985   : >> { %3551 = vtanh.f32 %v1649_v53  ;;  %v1659_v2 = vadd.f32 %v3589_v12, %v2857_v45  ;;  %v1653_v33 = vpop.f32.mrb[35].mxu1 }
 0x986   : >> { %v1654_v46 = vadd.f32 %v3589_v12, %v1653_v33 }
 0x988   : >> { %3553 = vtanh.f32 %v1654_v46  ;;  %v2860_v7 = vpop.f32.mrb[36].mxu1 }
 0x989   : >> { %3555 = vtanh.f32 %v1659_v2  ;;  %v1669_v54 = vadd.f32 %v3589_v12, %v2860_v7  ;;  %v1663_v36 = vpop.f32.mrb[37].mxu1 }
 0x98a   : >> { %v1664_v15 = vadd.f32 %v3589_v12, %v1663_v36 }
 0x98c   : >> { %3557 = vtanh.f32 %v1664_v15  ;;  %v2863_v57 = vpop.f32.mrb[38].mxu1 }
 0x98d   : >> { %3559 = vtanh.f32 %v1669_v54  ;;  %v1679_v42 = vadd.f32 %v3589_v12, %v2863_v57  ;;  %v1673_v26 = vpop.f32.mrb[39].mxu1 }
 0x98e   : >> { %v3550_v43 = vpop.eup %3549  ;;  %v1674_v63 = vadd.f32 %v3589_v12, %v1673_v26 }
 0x98f   : >> { %v3552_v56 = vpop.eup %3551  ;;  %2896 = vmatprep.mubr.f32.mxu0 %v3550_v43 }
 0x990   : >> { %3561 = vtanh.f32 %v1674_v63  ;;  %2897 = vmatmul.mubr.f32.vlgmr.msra.gmra.mrb[40].mxu0 %v3552_v56 }
 0x991   : >> { %3563 = vtanh.f32 %v1679_v42 }
 0x992   : >> { %v3554_v58 = vpop.eup %3553 }
 0x993   : >> { %v3556_v59 = vpop.eup %3555  ;;  %2899 = vmatprep.mubr.f32.mxu0 %v3554_v58 }
 0x994   : >> { %2900 = vmatmul.mubr.f32.gmra.mrb[42].mxu0 %v3556_v59 }
 0x996   : >> { %v3558_v61 = vpop.eup %3557 }
 0x997   : >> { %v3560_v35 = vpop.eup %3559  ;;  %2902 = vmatprep.mubr.f32.mxu0 %v3558_v61 }
 0x998   : >> { %2903 = vmatmul.mubr.f32.gmra.mrb[44].mxu0 %v3560_v35 }
 0x99a   : >> { %v3562_v14 = vpop.eup %3561 }
 0x99b   : >> { %v3564_v11 = vpop.eup %3563  ;;  %2905 = vmatprep.mubr.f32.mxu0 %v3562_v14 }
 0x99c   : >> { %2906 = vmatmul.mubr.f32.gmra.mrb[46].mxu0 %v3564_v11 }
 0xa63   : >> { %v2898_v13 = vpop.f32.mrb[40].mxu0 }
 0xa64   : >> { %v1762_v29 = vadd.f32 %v3590_v16, %v2898_v13  ;;  %v1756_v34 = vpop.f32.mrb[41].mxu0 }
 0xa65   : >> { %v1757_v31 = vadd.f32 %v3590_v16, %v1756_v34 }
 0xa67   : >> { %3565 = vtanh.f32 %v1757_v31  ;;  %v2901_v37 = vpop.f32.mrb[42].mxu0 }
 0xa68   : >> { %3567 = vtanh.f32 %v1762_v29  ;;  %v1772_v19 = vadd.f32 %v3590_v16, %v2901_v37  ;;  %v1766_v41 = vpop.f32.mrb[43].mxu0 }
 0xa69   : >> { %v1767_v9 = vadd.f32 %v3590_v16, %v1766_v41 }
 0xa6b   : >> { %3569 = vtanh.f32 %v1767_v9  ;;  %v2904_v44 = vpop.f32.mrb[44].mxu0 }
 0xa6c   : >> { %3571 = vtanh.f32 %v1772_v19  ;;  %v1782_v6 = vadd.f32 %v3590_v16, %v2904_v44  ;;  %v1776_v49 = vpop.f32.mrb[45].mxu0 }
 0xa6d   : >> { %v1777_v17 = vadd.f32 %v3590_v16, %v1776_v49 }
 0xa6f   : >> { %3573 = vtanh.f32 %v1777_v17  ;;  %v2907_v50 = vpop.f32.mrb[46].mxu0 }
 0xa70   : >> { %3575 = vtanh.f32 %v1782_v6  ;;  %v1792_v51 = vadd.f32 %v3590_v16, %v2907_v50  ;;  %v1786_v4 = vpop.f32.mrb[47].mxu0 }
 0xa71   : >> { %v3566_v10 = vpop.eup %3565  ;;  %v1787_v39 = vadd.f32 %v3590_v16, %v1786_v4 }
 0xa72   : >> { %v3568_v21 = vpop.eup %3567  ;;  %2940 = vmatprep.mubr.f32.mxu1 %v3566_v10 }
 0xa73   : >> { %3577 = vtanh.f32 %v1787_v39  ;;  %2941 = vmatmul.mubr.f32.vlgmr.msra.gmra.mrb[40].mxu1 %v3568_v21 }
 0xa74   : >> { %3579 = vtanh.f32 %v1792_v51 }
 0xa75   : >> { %v3570_v24 = vpop.eup %3569 }
 0xa76   : >> { %v3572_v27 = vpop.eup %3571  ;;  %2943 = vmatprep.mubr.f32.mxu1 %v3570_v24 }
 0xa77   : >> { %2944 = vmatmul.mubr.f32.gmra.mrb[42].mxu1 %v3572_v27 }
 0xa79   : >> { %v3574_v30 = vpop.eup %3573 }
 0xa7a   : >> { %v3576_v32 = vpop.eup %3575  ;;  %2946 = vmatprep.mubr.f32.mxu1 %v3574_v30 }
 0xa7b   : >> { %2947 = vmatmul.mubr.f32.gmra.mrb[44].mxu1 %v3576_v32 }
 0xa7d   : >> { %v3578_v18 = vpop.eup %3577 }
 0xa7e   : >> { %v3580_v55 = vpop.eup %3579  ;;  %2949 = vmatprep.mubr.f32.mxu1 %v3578_v18 }
 0xa7f   : >> { %2950 = vmatmul.mubr.f32.gmra.mrb[46].mxu1 %v3580_v55 }
 0xb46   : >> { %v2942_v25 = vpop.f32.mrb[40].mxu1 }
 0xb47   : >> { %v1875_v5 = vadd.f32 %v3591_v28, %v2942_v25  ;;  %v1869_v38 = vpop.f32.mrb[41].mxu1 }
 0xb48   : >> { %v1870_v22 = vadd.f32 %v3591_v28, %v1869_v38 }
 0xb49   : >> { %v1909_v8 = vmul.f32 %v1875_v5, %v4435_v40 }
 0xb4a   : >> { %v1908_v12 = vmul.f32 %v1870_v22, %v4435_v40  ;;  %v2945_v53 = vpop.f32.mrb[42].mxu1 }
 0xb4b   : >> { %v1917_v48 = vadd.f32 %v1909_v8, %v4581_v60  ;;  %v1885_v62 = vadd.f32 %v3591_v28, %v2945_v53  ;;  %v1879_v45 = vpop.f32.mrb[43].mxu1 }
 0xb4c   : >> { %v1916_v2 = vadd.f32 %v1908_v12, %v4585_v52  ;;  %v1880_v33 = vadd.f32 %v3591_v28, %v1879_v45 }
 0xb4d   : >> { %1925 = vst [vmem:[#allocation2 + $0x8] sm:$0xff] %v1917_v48  ;;  %1935 = vst [vmem:[%s4643_s28 + $0x8] sm:$0xff] %v1917_v48  ;;  %v1911_v46 = vmul.f32 %v1885_v62, %v4435_v40 }
 0xb4e   : >> { %1924 = vst [vmem:[#allocation2] sm:$0xff] %v1916_v2  ;;  %1934 = vst [vmem:[%s4643_s28] sm:$0xff] %v1916_v2  ;;  %v1910_v7 = vmul.f32 %v1880_v33, %v4435_v40  ;;  %v2948_v54 = vpop.f32.mrb[44].mxu1 }
 0xb4f   : >> { %v1919_v36 = vadd.f32 %v1911_v46, %v4591_v23  ;;  %v1895_v15 = vadd.f32 %v3591_v28, %v2948_v54  ;;  %v1889_v60 = vpop.f32.mrb[45].mxu1 }
 0xb50   : >> { %v1918_v57 = vadd.f32 %v1910_v7, %v4595_v1  ;;  %v1890_v42 = vadd.f32 %v3591_v28, %v1889_v60 }
 0xb51   : >> { %1927 = vst [vmem:[#allocation2 + $0x18] sm:$0xff] %v1919_v36  ;;  %1937 = vst [vmem:[%s4643_s28 + $0x18] sm:$0xff] %v1919_v36  ;;  %v1913_v52 = vmul.f32 %v1895_v15, %v4435_v40 }
 0xb52   : >> { %1926 = vst [vmem:[#allocation2 + $0x10] sm:$0xff] %v1918_v57  ;;  %1936 = vst [vmem:[%s4643_s28 + $0x10] sm:$0xff] %v1918_v57  ;;  %v1912_v26 = vmul.f32 %v1890_v42, %v4435_v40  ;;  %v2951_v43 = vpop.f32.mrb[46].mxu1 }
 0xb53   : >> { %v1921_v63 = vadd.f32 %v1913_v52, %v4603_v20  ;;  %v1905_v23 = vadd.f32 %v3591_v28, %v2951_v43  ;;  %v1899_v56 = vpop.f32.mrb[47].mxu1 }
 0xb54   : >> { %v1920_v58 = vadd.f32 %v1912_v26, %v4607_v3  ;;  %v1900_v1 = vadd.f32 %v3591_v28, %v1899_v56  ;;  %393 = sbr.rel (!%p391_p0) target bundleno = 164 (0xa4), region = 122 }
 0xb55   : >> { %1929 = vst [vmem:[#allocation2 + $0x28] sm:$0xff] %v1921_v63  ;;  %1939 = vst [vmem:[%s4643_s28 + $0x28] sm:$0xff] %v1921_v63  ;;  %v1915_v59 = vmul.f32 %v1905_v23, %v4435_v40 }
 0xb56   : >> { %1928 = vst [vmem:[#allocation2 + $0x20] sm:$0xff] %v1920_v58  ;;  %1938 = vst [vmem:[%s4643_s28 + $0x20] sm:$0xff] %v1920_v58  ;;  %v1914_v61 = vmul.f32 %v1900_v1, %v4435_v40 }
 0xb57   : >> { %v1923_v35 = vadd.f32 %v1915_v59, %v4615_v47 }
 0xb58   : >> { %v1922_v14 = vadd.f32 %v1914_v61, %v4618_v0 }
 0xb59   : >> { %1931 = vst [vmem:[#allocation2 + $0x38] sm:$0xff] %v1923_v35  ;;  %1941 = vst [vmem:[%s4643_s28 + $0x38] sm:$0xff] %v1923_v35 }
 0xb5a   : >> { %1930 = vst [vmem:[#allocation2 + $0x30] sm:$0xff] %v1922_v14  ;;  %1940 = vst [vmem:[%s4643_s28 + $0x30] sm:$0xff] %v1922_v14 }
 0xb5b   : > { %s2135_s19 = sshll.u32 %s3788_s25, 10  ;;  %s1975_s23 = sshll.u32 %s4122_s30, 4  ;;  %s1976_s23 = int_to_ptr.vmem [resolvable:$true] %s1975_s23 }
 0xb5c   : > { %s4749_s18 = sld [smem:[#allocation25_spill]]  ;;  %s3810_s11 = smov 1024  }
 0xb5d   : > { %3350 = sst [smem:[#allocation16]] (%p4041_p4), %s3810_s11  ;;  %s3811_s14 = smov 2048  }
 0xb5e   : > { %3351 = sst [smem:[#allocation16 + $0x1]] (%p4041_p4), %s3811_s14  ;;  %s3812_s22 = smov 8  }
 0xb5f   : > { %3352 = sst [smem:[#allocation16 + $0x2]] (%p4041_p4), %s3812_s22  ;;  %s3813_s0 = smov 128  }
 0xb60   : > { %3353 = sst [smem:[#allocation16 + $0x3]] (%p4041_p4), %s3813_s0  ;;  %s3814_s25 = smov [#allocation15]  }
 0xb61   : > { %3354 = sst [smem:[#allocation16 + $0x4]] (%p4041_p4), %s3813_s0  ;;  %s3815_s30 = smov 0  }
 0xb62   : > { %s1958_s8 = scalar_lea.hbm %s4749_s18, %s2135_s19  ;;  %3355 = sst [smem:[#allocation16 + $0x5]] (%p4041_p4), %s3812_s22 }
 0xb63   : > { %3356 = dma.general (%p4041_p4), %s1976_s23, 8192, %s1958_s8, %s1943_s17, %s3814_s25, [#allocation16], %s3815_s30, 0  }
 0xb64 PF: > { %s4750_s21 = sld [smem:[#allocation22_spill]]  ;;  %s4751_s12 = sld [smem:[#allocation23_spill]] }
 0xb65   : > { %p4753_p13 = scmp.ge.s32.totalorder %s3796_s27, 2 }
 0xb6a   : > { %s2003_s20 = sand.u32 1, %s4750_s21   ;;  %p4752_p11 = scmp.ne.s32.totalorder %s4751_s12, 0 }
 0xb6b   : > { %s2004_s28 = scalar_lea.sflag [#allocation8], %s2003_s20 }
 0xb6c   : > { %p3373_p1 = pnand %p4753_p13, %p4752_p11 }
 0xb6e   : > { %3771 = dma.done.wait (!%p3373_p1), %s2004_s28, 8192  }
 0xb6f   : > { %3773 = vsyncadd (!%p3373_p1), %s2004_s28, 4294959104  ;;  %s35_s27 = sadd.s32 1, %s3796_s27   ;;  %s4754_s0 = smov %s3780_s1 }
 0xb70   : > { %p32_p3 = scmp.ge.s32.totalorder %s35_s27, 4   ;;  %s4755_s1 = smov %s3784_s24 }
 0xb71   : > { %s4756_s24 = smov %s4053_s29  ;;  %s4757_s25 = smov %s3792_s26 }
 0xb72   : > { %s4758_s26 = smov %s4760_s16  ;;  %34 = sbr.rel (!%p32_p3) target bundleno = 31 (0x1f), region = 133 }
 0xb79   :  { %2009 = vsyncpa [#allocation7], 1 }
 0xb7a   :  { %2011 = vsyncpa [#allocation7 + $0x1], 1 }
 0xb7b   :  { %2012 = vsyncpa [#allocation10], 1 }
 0xb7c   :  { %2013 = vsyncpa [#allocation13], 1 }
 0xb7d   :  { %2014 = vsyncpa [#allocation8], 1 }
 0xb7e   :  { %2016 = vsyncpa [#allocation8 + $0x1], 1 }

</bundles_post_ra>
